<compile_context>
chip_gen: v6e
topology: v6e:2x2x1
jax: 0.10.0
libtpu: 0.0.40
codegen_flags: <defaults>
</compile_context>

<pallas_src>
import jax
import jax.numpy as jnp
from jax import lax
from jax.experimental import pallas as pl
from jax.experimental.pallas import tpu as pltpu


def _complex_upsample_kernel(xpad_ref, dw3_ref, dw5_ref, p3_ref, p5_ref,
                             bias_ref, uh_ref, bw_ref, out_ref):
    Hp, WpC = xpad_ref.shape[1], xpad_ref.shape[2]
    WC_in = dw3_ref.shape[1]            # W * Cin  (lane width of the depthwise tile)
    H = Hp - 4
    Cin = (WpC - WC_in) // 4            # xpad carries 2+2 padded columns

    x = xpad_ref[0]                     # (Hp, Wp*Cin), lane-dense

    def depthwise(k, dw_ref):
        off = 2 - k // 2                # 3x3 (pad=1) starts at 1, 5x5 (pad=2) at 0
        acc = jnp.zeros((H, WC_in), jnp.float32)
        for ky in range(k):
            for kx in range(k):
                t = ky * k + kx
                tap = x[off + ky: off + ky + H,
                        (off + kx) * Cin: (off + kx) * Cin + WC_in]
                acc = acc + tap * dw_ref[t:t + 1, :]     # BN scale pre-folded
        return acc                      # (H, W*Cin)

    acc3 = depthwise(3, dw3_ref)
    acc5 = depthwise(5, dw5_ref)

    # pointwise 1x1 conv (+ folded output BN) as block-diagonal MXU matmuls, then ReLU
    z3 = jnp.maximum(
        jnp.dot(acc3, p3_ref[...], preferred_element_type=jnp.float32)
        + bias_ref[0:1, :], 0.0)
    z5 = jnp.maximum(
        jnp.dot(acc5, p5_ref[...], preferred_element_type=jnp.float32)
        + bias_ref[1:2, :], 0.0)
    z = z3 + z5                         # (H, W*Cout)

    # separable 2x bilinear upsample (align_corners=False): two small matmuls
    zh = jnp.dot(uh_ref[...], z, preferred_element_type=jnp.float32)        # (2H, W*Cout)
    out_ref[0] = jnp.dot(zh, bw_ref[...], preferred_element_type=jnp.float32)  # (2H, 2W*Cout)


def _upsample_matrix(L):
    """(2L, L) bilinear x2 interpolation matrix, PyTorch align_corners=False."""
    i = jnp.arange(2 * L, dtype=jnp.float32)
    src = jnp.clip(0.5 * i - 0.25, 0.0, float(L - 1))
    x0 = jnp.floor(src).astype(jnp.int32)
    x1 = jnp.minimum(x0 + 1, L - 1)
    frac = src - x0.astype(jnp.float32)
    return ((1.0 - frac)[:, None] * jax.nn.one_hot(x0, L, dtype=jnp.float32)
            + frac[:, None] * jax.nn.one_hot(x1, L, dtype=jnp.float32))


def complex_upsample_pallas(x_nchw, dw3, dw5, pw, bn_dw, bn_out):
    N, Cin, H, W = x_nchw.shape
    Cout = pw.shape[2]
    f32 = jnp.float32

    # ---- fold inference-mode BatchNorm into weights / one bias per branch ----
    s_dw3, b_dw3, s_dw5, b_dw5 = bn_dw[0], bn_dw[1], bn_dw[2], bn_dw[3]
    s_o3, b_o3, s_o5, b_o5 = bn_out[0], bn_out[1], bn_out[2], bn_out[3]

    dw3_eff = dw3 * s_dw3                     # (3,3,Cin)
    dw5_eff = dw5 * s_dw5                     # (5,5,Cin)
    pw3_eff = pw[0] * s_o3[None, :]           # (Cin, Cout)
    pw5_eff = pw[1] * s_o5[None, :]
    bias3 = b_dw3 @ pw3_eff + b_o3            # (Cout,)
    bias5 = b_dw5 @ pw5_eff + b_o5

    # ---- lane-dense constant operands ----
    # depthwise weights tiled across W so they multiply the (H, W*Cin) tile directly
    dw3_t = jnp.tile(dw3_eff.reshape(9, Cin), (1, W))        # (9,  W*Cin)
    dw5_t = jnp.tile(dw5_eff.reshape(25, Cin), (1, W))       # (25, W*Cin)
    # pointwise conv as block-diagonal matmul on the lane-flattened layout
    eyeW = jnp.eye(W, dtype=f32)
    P3 = jnp.kron(eyeW, pw3_eff)                             # (W*Cin, W*Cout)
    P5 = jnp.kron(eyeW, pw5_eff)
    bias_t = jnp.stack([jnp.tile(bias3, W), jnp.tile(bias5, W)])   # (2, W*Cout)
    # separable upsample operators
    Uh = _upsample_matrix(H)                                 # (2H, H)
    Uw = _upsample_matrix(W)                                 # (2W, W)
    Bw = jnp.kron(Uw.T, jnp.eye(Cout, dtype=f32))            # (W*Cout, 2W*Cout)

    # ---- input: NCHW -> NHWC, pad 2, flatten W and C onto the lane axis ----
    x = jnp.transpose(x_nchw, (0, 2, 3, 1))
    xpad = jnp.pad(x, ((0, 0), (2, 2), (2, 2), (0, 0)))
    xpad_f = xpad.reshape(N, H + 4, (W + 4) * Cin)

    flops = int(
        N * (34 * H * W * Cin * 2                              # depthwise taps (VPU)
             + 2 * 2 * H * (W * Cin) * (W * Cout)              # pointwise block-diag matmuls
             + 2 * (2 * H) * H * (W * Cout)                    # H upsample matmul
             + 2 * (2 * H) * (W * Cout) * (2 * W * Cout)))     # W upsample matmul
    bytes_accessed = int(4 * (
        N * (H + 4) * (W + 4) * Cin
        + (9 + 25) * W * Cin
        + 2 * (W * Cin) * (W * Cout)
        + 2 * W * Cout
        + 2 * H * H + (W * Cout) * (2 * W * Cout)
        + N * (2 * H) * (2 * W) * Cout))

    out_flat = pl.pallas_call(
        _complex_upsample_kernel,
        out_shape=jax.ShapeDtypeStruct((N, 2 * H, 2 * W * Cout), f32),
        grid_spec=pltpu.PrefetchScalarGridSpec(
            num_scalar_prefetch=0,
            grid=(N,),
            in_specs=[
                pl.BlockSpec((1, H + 4, (W + 4) * Cin), lambda n: (n, 0, 0)),
                pl.BlockSpec((9, W * Cin), lambda n: (0, 0)),
                pl.BlockSpec((25, W * Cin), lambda n: (0, 0)),
                pl.BlockSpec((W * Cin, W * Cout), lambda n: (0, 0)),
                pl.BlockSpec((W * Cin, W * Cout), lambda n: (0, 0)),
                pl.BlockSpec((2, W * Cout), lambda n: (0, 0)),
                pl.BlockSpec((2 * H, H), lambda n: (0, 0)),
                pl.BlockSpec((W * Cout, 2 * W * Cout), lambda n: (0, 0)),
            ],
            out_specs=pl.BlockSpec((1, 2 * H, 2 * W * Cout), lambda n: (n, 0, 0)),
        ),
        compiler_params=pltpu.CompilerParams(
            dimension_semantics=("parallel",)),
        cost_estimate=pl.CostEstimate(flops=flops, transcendentals=0,
                                      bytes_accessed=bytes_accessed),
    )(xpad_f, dw3_t, dw5_t, P3, P5, bias_t, Uh, Bw)

    out = out_flat.reshape(N, 2 * H, 2 * W, Cout)
    return jnp.transpose(out, (0, 3, 1, 2))                   # back to NCHW


# ---------------- deterministic parameter construction ----------------
def make_params(key, cin, cout):
    eps = 1e-5
    ks = jax.random.split(key, 20)

    def bn_fold(k4, c):
        gamma = jax.random.uniform(k4[0], (c,), jnp.float32, 0.5, 1.5)
        beta = jax.random.uniform(k4[1], (c,), jnp.float32, -0.5, 0.5)
        mean = jax.random.uniform(k4[2], (c,), jnp.float32, -0.2, 0.2)
        var = jax.random.uniform(k4[3], (c,), jnp.float32, 0.5, 1.5)
        scale = gamma / jnp.sqrt(var + eps)
        bias = beta - mean * scale
        return scale, bias

    dw3 = jax.random.normal(ks[0], (3, 3, cin), jnp.float32) * 0.3
    dw5 = jax.random.normal(ks[1], (5, 5, cin), jnp.float32) * 0.15
    pw3 = jax.random.normal(ks[2], (cin, cout), jnp.float32) * 0.3
    pw5 = jax.random.normal(ks[3], (cin, cout), jnp.float32) * 0.3
    s_dw3, b_dw3 = bn_fold(ks[4:8], cin)      # SeparableConv2d.bn_depthwise (3x3)
    s_dw5, b_dw5 = bn_fold(ks[8:12], cin)     # SeparableConv2d.bn_depthwise (5x5)
    s_o3, b_o3 = bn_fold(ks[12:16], cout)     # conv1 outer BatchNorm2d
    s_o5, b_o5 = bn_fold(ks[16:20], cout)     # conv2 outer BatchNorm2d

    pw = jnp.stack([pw3, pw5])                              # (2, cin, cout)
    bn_dw = jnp.stack([s_dw3, b_dw3, s_dw5, b_dw5])         # (4, cin)
    bn_out = jnp.stack([s_o3, b_o3, s_o5, b_o5])            # (4, cout)
    return dw3, dw5, pw, bn_dw, bn_out


# ---------------- pure-JAX reference for verification ----------------
def reference(x_nchw, dw3, dw5, pw, bn_dw, bn_out):
    x = jnp.transpose(x_nchw, (0, 2, 3, 1))  # NHWC

    def sep_branch(x, dw, pwm, s_dw, b_dw, s_o, b_o, k):
        pad = k // 2
        y = lax.conv_general_dilated(
            x, dw[:, :, None, :], window_strides=(1, 1),
            padding=[(pad, pad), (pad, pad)],
            dimension_numbers=('NHWC', 'HWIO', 'NHWC'),
            feature_group_count=x.shape[-1],
            precision=lax.Precision.HIGHEST)
        y = y * s_dw + b_dw
        y = lax.conv_general_dilated(
            y, pwm[None, None, :, :], window_strides=(1, 1), padding='VALID',
            dimension_numbers=('NHWC', 'HWIO', 'NHWC'),
            precision=lax.Precision.HIGHEST)
        return jnp.maximum(y * s_o + b_o, 0.0)

    z = (sep_branch(x, dw3, pw[0], bn_dw[0], bn_dw[1], bn_out[0], bn_out[1], 3)
         + sep_branch(x, dw5, pw[1], bn_dw[2], bn_dw[3], bn_out[2], bn_out[3], 5))

    N, H, W, C = z.shape

    def coords(L):
        i = jnp.arange(2 * L, dtype=jnp.float32)
        src = jnp.clip(0.5 * i - 0.25, 0.0, float(L - 1))
        x0 = jnp.floor(src).astype(jnp.int32)
        x1 = jnp.minimum(x0 + 1, L - 1)
        return x0, x1, src - x0.astype(jnp.float32)

    h0, h1, hf = coords(H)
    w0, w1, wf = coords(W)
    zh = (z[:, h0] * (1 - hf)[None, :, None, None]
          + z[:, h1] * hf[None, :, None, None])
    out = (zh[:, :, w0] * (1 - wf)[None, None, :, None]
           + zh[:, :, w1] * wf[None, None, :, None])
    return jnp.transpose(out, (0, 3, 1, 2))


if __name__ == "__main__":
    key = jax.random.PRNGKey(0)
    N, Cin, Cout, H, W = 2, 8, 8, 16, 16
    kx, kp = jax.random.split(key)
    x = jax.random.normal(kx, (N, Cin, H, W), jnp.float32)
    params = make_params(kp, Cin, Cout)

    out = complex_upsample_pallas(x, *params)
    out = jax.block_until_ready(out)
    assert out.shape == (N, Cout, 2 * H, 2 * W), out.shape

    ref = reference(x, *params)
    err = float(jnp.max(jnp.abs(out - ref)))
    if not jnp.allclose(out, ref, atol=2e-3, rtol=2e-3):
        raise AssertionError(f"mismatch vs reference, max abs err = {err}")
    print("KERNEL_OK")
</pallas_src>

<mosaic_0001>
module attributes {stable_mosaic.version = 11 : i64} {
  func.func @_complex_upsample_kernel(%arg0: i32, %arg1: memref<1x20x160xf32, #tpu.memory_space<vmem>>, %arg2: memref<9x128xf32, #tpu.memory_space<vmem>>, %arg3: memref<25x128xf32, #tpu.memory_space<vmem>>, %arg4: memref<128x128xf32, #tpu.memory_space<vmem>>, %arg5: memref<128x128xf32, #tpu.memory_space<vmem>>, %arg6: memref<2x128xf32, #tpu.memory_space<vmem>>, %arg7: memref<32x16xf32, #tpu.memory_space<vmem>>, %arg8: memref<128x256xf32, #tpu.memory_space<vmem>>, %arg9: memref<1x32x256xf32, #tpu.memory_space<vmem>>) attributes {dimension_semantics = [#tpu.dimension_semantics<parallel>], iteration_bounds = array<i64: 2>, scalar_prefetch = 0 : i64, scratch_operands = 0 : i64, tpu.core_type = #tpu.core_type<tc>, window_params = [{transform_indices = @transform_0, window_bounds = array<i64: 1, 20, 160>}, {pipeline_mode = #tpu.pipeline_mode<synchronous>, transform_indices = @transform_1, window_bounds = array<i64: 9, 128>}, {pipeline_mode = #tpu.pipeline_mode<synchronous>, transform_indices = @transform_2, window_bounds = array<i64: 25, 128>}, {pipeline_mode = #tpu.pipeline_mode<synchronous>, transform_indices = @transform_3, window_bounds = array<i64: 128, 128>}, {pipeline_mode = #tpu.pipeline_mode<synchronous>, transform_indices = @transform_4, window_bounds = array<i64: 128, 128>}, {pipeline_mode = #tpu.pipeline_mode<synchronous>, transform_indices = @transform_5, window_bounds = array<i64: 2, 128>}, {pipeline_mode = #tpu.pipeline_mode<synchronous>, transform_indices = @transform_6, window_bounds = array<i64: 32, 16>}, {pipeline_mode = #tpu.pipeline_mode<synchronous>, transform_indices = @transform_7, window_bounds = array<i64: 128, 256>}, {transform_indices = @transform_8, window_bounds = array<i64: 1, 32, 256>}]} {
    %c0 = arith.constant 0 : index
    %c0_0 = arith.constant 0 : index
    %c0_1 = arith.constant 0 : index
    %0 = vector.load %arg1[%c0, %c0_0, %c0_1] : memref<1x20x160xf32, #tpu.memory_space<vmem>>, vector<1x20x160xf32>
    %1 = vector.shape_cast %0 : vector<1x20x160xf32> to vector<20x160xf32>
    %cst = arith.constant 0.000000e+00 : f32
    %2 = vector.broadcast %cst : f32 to vector<16x128xf32>
    %3 = vector.extract_strided_slice %1 {offsets = [1, 8], sizes = [16, 128], strides = [1, 1]} : vector<20x160xf32> to vector<16x128xf32>
    %c0_2 = arith.constant 0 : index
    %c0_3 = arith.constant 0 : index
    %4 = vector.load %arg2[%c0_2, %c0_3] : memref<9x128xf32, #tpu.memory_space<vmem>>, vector<1x128xf32>
    %5 = vector.broadcast %4 : vector<1x128xf32> to vector<16x128xf32>
    %6 = arith.mulf %3, %5 : vector<16x128xf32>
    %7 = arith.addf %2, %6 : vector<16x128xf32>
    %8 = vector.extract_strided_slice %1 {offsets = [1, 16], sizes = [16, 128], strides = [1, 1]} : vector<20x160xf32> to vector<16x128xf32>
    %c1 = arith.constant 1 : index
    %c0_4 = arith.constant 0 : index
    %9 = vector.load %arg2[%c1, %c0_4] : memref<9x128xf32, #tpu.memory_space<vmem>>, vector<1x128xf32>
    %10 = vector.broadcast %9 : vector<1x128xf32> to vector<16x128xf32>
    %11 = arith.mulf %8, %10 : vector<16x128xf32>
    %12 = arith.addf %7, %11 : vector<16x128xf32>
    %13 = vector.extract_strided_slice %1 {offsets = [1, 24], sizes = [16, 128], strides = [1, 1]} : vector<20x160xf32> to vector<16x128xf32>
    %c2 = arith.constant 2 : index
    %c0_5 = arith.constant 0 : index
    %14 = vector.load %arg2[%c2, %c0_5] : memref<9x128xf32, #tpu.memory_space<vmem>>, vector<1x128xf32>
    %15 = vector.broadcast %14 : vector<1x128xf32> to vector<16x128xf32>
    %16 = arith.mulf %13, %15 : vector<16x128xf32>
    %17 = arith.addf %12, %16 : vector<16x128xf32>
    %18 = vector.extract_strided_slice %1 {offsets = [2, 8], sizes = [16, 128], strides = [1, 1]} : vector<20x160xf32> to vector<16x128xf32>
    %c3 = arith.constant 3 : index
    %c0_6 = arith.constant 0 : index
    %19 = vector.load %arg2[%c3, %c0_6] : memref<9x128xf32, #tpu.memory_space<vmem>>, vector<1x128xf32>
    %20 = vector.broadcast %19 : vector<1x128xf32> to vector<16x128xf32>
    %21 = arith.mulf %18, %20 : vector<16x128xf32>
    %22 = arith.addf %17, %21 : vector<16x128xf32>
    %23 = vector.extract_strided_slice %1 {offsets = [2, 16], sizes = [16, 128], strides = [1, 1]} : vector<20x160xf32> to vector<16x128xf32>
    %c4 = arith.constant 4 : index
    %c0_7 = arith.constant 0 : index
    %24 = vector.load %arg2[%c4, %c0_7] : memref<9x128xf32, #tpu.memory_space<vmem>>, vector<1x128xf32>
    %25 = vector.broadcast %24 : vector<1x128xf32> to vector<16x128xf32>
    %26 = arith.mulf %23, %25 : vector<16x128xf32>
    %27 = arith.addf %22, %26 : vector<16x128xf32>
    %28 = vector.extract_strided_slice %1 {offsets = [2, 24], sizes = [16, 128], strides = [1, 1]} : vector<20x160xf32> to vector<16x128xf32>
    %c5 = arith.constant 5 : index
    %c0_8 = arith.constant 0 : index
    %29 = vector.load %arg2[%c5, %c0_8] : memref<9x128xf32, #tpu.memory_space<vmem>>, vector<1x128xf32>
    %30 = vector.broadcast %29 : vector<1x128xf32> to vector<16x128xf32>
    %31 = arith.mulf %28, %30 : vector<16x128xf32>
    %32 = arith.addf %27, %31 : vector<16x128xf32>
    %33 = vector.extract_strided_slice %1 {offsets = [3, 8], sizes = [16, 128], strides = [1, 1]} : vector<20x160xf32> to vector<16x128xf32>
    %c6 = arith.constant 6 : index
    %c0_9 = arith.constant 0 : index
    %34 = vector.load %arg2[%c6, %c0_9] : memref<9x128xf32, #tpu.memory_space<vmem>>, vector<1x128xf32>
    %35 = vector.broadcast %34 : vector<1x128xf32> to vector<16x128xf32>
    %36 = arith.mulf %33, %35 : vector<16x128xf32>
    %37 = arith.addf %32, %36 : vector<16x128xf32>
    %38 = vector.extract_strided_slice %1 {offsets = [3, 16], sizes = [16, 128], strides = [1, 1]} : vector<20x160xf32> to vector<16x128xf32>
    %c7 = arith.constant 7 : index
    %c0_10 = arith.constant 0 : index
    %39 = vector.load %arg2[%c7, %c0_10] : memref<9x128xf32, #tpu.memory_space<vmem>>, vector<1x128xf32>
    %40 = vector.broadcast %39 : vector<1x128xf32> to vector<16x128xf32>
    %41 = arith.mulf %38, %40 : vector<16x128xf32>
    %42 = arith.addf %37, %41 : vector<16x128xf32>
    %43 = vector.extract_strided_slice %1 {offsets = [3, 24], sizes = [16, 128], strides = [1, 1]} : vector<20x160xf32> to vector<16x128xf32>
    %c8 = arith.constant 8 : index
    %c0_11 = arith.constant 0 : index
    %44 = vector.load %arg2[%c8, %c0_11] : memref<9x128xf32, #tpu.memory_space<vmem>>, vector<1x128xf32>
    %45 = vector.broadcast %44 : vector<1x128xf32> to vector<16x128xf32>
    %46 = arith.mulf %43, %45 : vector<16x128xf32>
    %47 = arith.addf %42, %46 : vector<16x128xf32>
    %cst_12 = arith.constant 0.000000e+00 : f32
    %48 = vector.broadcast %cst_12 : f32 to vector<16x128xf32>
    %49 = vector.extract_strided_slice %1 {offsets = [0, 0], sizes = [16, 128], strides = [1, 1]} : vector<20x160xf32> to vector<16x128xf32>
    %c0_13 = arith.constant 0 : index
    %c0_14 = arith.constant 0 : index
    %50 = vector.load %arg3[%c0_13, %c0_14] : memref<25x128xf32, #tpu.memory_space<vmem>>, vector<1x128xf32>
    %51 = vector.broadcast %50 : vector<1x128xf32> to vector<16x128xf32>
    %52 = arith.mulf %49, %51 : vector<16x128xf32>
    %53 = arith.addf %48, %52 : vector<16x128xf32>
    %54 = vector.extract_strided_slice %1 {offsets = [0, 8], sizes = [16, 128], strides = [1, 1]} : vector<20x160xf32> to vector<16x128xf32>
    %c1_15 = arith.constant 1 : index
    %c0_16 = arith.constant 0 : index
    %55 = vector.load %arg3[%c1_15, %c0_16] : memref<25x128xf32, #tpu.memory_space<vmem>>, vector<1x128xf32>
    %56 = vector.broadcast %55 : vector<1x128xf32> to vector<16x128xf32>
    %57 = arith.mulf %54, %56 : vector<16x128xf32>
    %58 = arith.addf %53, %57 : vector<16x128xf32>
    %59 = vector.extract_strided_slice %1 {offsets = [0, 16], sizes = [16, 128], strides = [1, 1]} : vector<20x160xf32> to vector<16x128xf32>
    %c2_17 = arith.constant 2 : index
    %c0_18 = arith.constant 0 : index
    %60 = vector.load %arg3[%c2_17, %c0_18] : memref<25x128xf32, #tpu.memory_space<vmem>>, vector<1x128xf32>
    %61 = vector.broadcast %60 : vector<1x128xf32> to vector<16x128xf32>
    %62 = arith.mulf %59, %61 : vector<16x128xf32>
    %63 = arith.addf %58, %62 : vector<16x128xf32>
    %64 = vector.extract_strided_slice %1 {offsets = [0, 24], sizes = [16, 128], strides = [1, 1]} : vector<20x160xf32> to vector<16x128xf32>
    %c3_19 = arith.constant 3 : index
    %c0_20 = arith.constant 0 : index
    %65 = vector.load %arg3[%c3_19, %c0_20] : memref<25x128xf32, #tpu.memory_space<vmem>>, vector<1x128xf32>
    %66 = vector.broadcast %65 : vector<1x128xf32> to vector<16x128xf32>
    %67 = arith.mulf %64, %66 : vector<16x128xf32>
    %68 = arith.addf %63, %67 : vector<16x128xf32>
    %69 = vector.extract_strided_slice %1 {offsets = [0, 32], sizes = [16, 128], strides = [1, 1]} : vector<20x160xf32> to vector<16x128xf32>
    %c4_21 = arith.constant 4 : index
    %c0_22 = arith.constant 0 : index
    %70 = vector.load %arg3[%c4_21, %c0_22] : memref<25x128xf32, #tpu.memory_space<vmem>>, vector<1x128xf32>
    %71 = vector.broadcast %70 : vector<1x128xf32> to vector<16x128xf32>
    %72 = arith.mulf %69, %71 : vector<16x128xf32>
    %73 = arith.addf %68, %72 : vector<16x128xf32>
    %74 = vector.extract_strided_slice %1 {offsets = [1, 0], sizes = [16, 128], strides = [1, 1]} : vector<20x160xf32> to vector<16x128xf32>
    %c5_23 = arith.constant 5 : index
    %c0_24 = arith.constant 0 : index
    %75 = vector.load %arg3[%c5_23, %c0_24] : memref<25x128xf32, #tpu.memory_space<vmem>>, vector<1x128xf32>
    %76 = vector.broadcast %75 : vector<1x128xf32> to vector<16x128xf32>
    %77 = arith.mulf %74, %76 : vector<16x128xf32>
    %78 = arith.addf %73, %77 : vector<16x128xf32>
    %79 = vector.extract_strided_slice %1 {offsets = [1, 8], sizes = [16, 128], strides = [1, 1]} : vector<20x160xf32> to vector<16x128xf32>
    %c6_25 = arith.constant 6 : index
    %c0_26 = arith.constant 0 : index
    %80 = vector.load %arg3[%c6_25, %c0_26] : memref<25x128xf32, #tpu.memory_space<vmem>>, vector<1x128xf32>
    %81 = vector.broadcast %80 : vector<1x128xf32> to vector<16x128xf32>
    %82 = arith.mulf %79, %81 : vector<16x128xf32>
    %83 = arith.addf %78, %82 : vector<16x128xf32>
    %84 = vector.extract_strided_slice %1 {offsets = [1, 16], sizes = [16, 128], strides = [1, 1]} : vector<20x160xf32> to vector<16x128xf32>
    %c7_27 = arith.constant 7 : index
    %c0_28 = arith.constant 0 : index
    %85 = vector.load %arg3[%c7_27, %c0_28] : memref<25x128xf32, #tpu.memory_space<vmem>>, vector<1x128xf32>
    %86 = vector.broadcast %85 : vector<1x128xf32> to vector<16x128xf32>
    %87 = arith.mulf %84, %86 : vector<16x128xf32>
    %88 = arith.addf %83, %87 : vector<16x128xf32>
    %89 = vector.extract_strided_slice %1 {offsets = [1, 24], sizes = [16, 128], strides = [1, 1]} : vector<20x160xf32> to vector<16x128xf32>
    %c8_29 = arith.constant 8 : index
    %c0_30 = arith.constant 0 : index
    %90 = vector.load %arg3[%c8_29, %c0_30] : memref<25x128xf32, #tpu.memory_space<vmem>>, vector<1x128xf32>
    %91 = vector.broadcast %90 : vector<1x128xf32> to vector<16x128xf32>
    %92 = arith.mulf %89, %91 : vector<16x128xf32>
    %93 = arith.addf %88, %92 : vector<16x128xf32>
    %94 = vector.extract_strided_slice %1 {offsets = [1, 32], sizes = [16, 128], strides = [1, 1]} : vector<20x160xf32> to vector<16x128xf32>
    %c9 = arith.constant 9 : index
    %c0_31 = arith.constant 0 : index
    %95 = vector.load %arg3[%c9, %c0_31] : memref<25x128xf32, #tpu.memory_space<vmem>>, vector<1x128xf32>
    %96 = vector.broadcast %95 : vector<1x128xf32> to vector<16x128xf32>
    %97 = arith.mulf %94, %96 : vector<16x128xf32>
    %98 = arith.addf %93, %97 : vector<16x128xf32>
    %99 = vector.extract_strided_slice %1 {offsets = [2, 0], sizes = [16, 128], strides = [1, 1]} : vector<20x160xf32> to vector<16x128xf32>
    %c10 = arith.constant 10 : index
    %c0_32 = arith.constant 0 : index
    %100 = vector.load %arg3[%c10, %c0_32] : memref<25x128xf32, #tpu.memory_space<vmem>>, vector<1x128xf32>
    %101 = vector.broadcast %100 : vector<1x128xf32> to vector<16x128xf32>
    %102 = arith.mulf %99, %101 : vector<16x128xf32>
    %103 = arith.addf %98, %102 : vector<16x128xf32>
    %104 = vector.extract_strided_slice %1 {offsets = [2, 8], sizes = [16, 128], strides = [1, 1]} : vector<20x160xf32> to vector<16x128xf32>
    %c11 = arith.constant 11 : index
    %c0_33 = arith.constant 0 : index
    %105 = vector.load %arg3[%c11, %c0_33] : memref<25x128xf32, #tpu.memory_space<vmem>>, vector<1x128xf32>
    %106 = vector.broadcast %105 : vector<1x128xf32> to vector<16x128xf32>
    %107 = arith.mulf %104, %106 : vector<16x128xf32>
    %108 = arith.addf %103, %107 : vector<16x128xf32>
    %109 = vector.extract_strided_slice %1 {offsets = [2, 16], sizes = [16, 128], strides = [1, 1]} : vector<20x160xf32> to vector<16x128xf32>
    %c12 = arith.constant 12 : index
    %c0_34 = arith.constant 0 : index
    %110 = vector.load %arg3[%c12, %c0_34] : memref<25x128xf32, #tpu.memory_space<vmem>>, vector<1x128xf32>
    %111 = vector.broadcast %110 : vector<1x128xf32> to vector<16x128xf32>
    %112 = arith.mulf %109, %111 : vector<16x128xf32>
    %113 = arith.addf %108, %112 : vector<16x128xf32>
    %114 = vector.extract_strided_slice %1 {offsets = [2, 24], sizes = [16, 128], strides = [1, 1]} : vector<20x160xf32> to vector<16x128xf32>
    %c13 = arith.constant 13 : index
    %c0_35 = arith.constant 0 : index
    %115 = vector.load %arg3[%c13, %c0_35] : memref<25x128xf32, #tpu.memory_space<vmem>>, vector<1x128xf32>
    %116 = vector.broadcast %115 : vector<1x128xf32> to vector<16x128xf32>
    %117 = arith.mulf %114, %116 : vector<16x128xf32>
    %118 = arith.addf %113, %117 : vector<16x128xf32>
    %119 = vector.extract_strided_slice %1 {offsets = [2, 32], sizes = [16, 128], strides = [1, 1]} : vector<20x160xf32> to vector<16x128xf32>
    %c14 = arith.constant 14 : index
    %c0_36 = arith.constant 0 : index
    %120 = vector.load %arg3[%c14, %c0_36] : memref<25x128xf32, #tpu.memory_space<vmem>>, vector<1x128xf32>
    %121 = vector.broadcast %120 : vector<1x128xf32> to vector<16x128xf32>
    %122 = arith.mulf %119, %121 : vector<16x128xf32>
    %123 = arith.addf %118, %122 : vector<16x128xf32>
    %124 = vector.extract_strided_slice %1 {offsets = [3, 0], sizes = [16, 128], strides = [1, 1]} : vector<20x160xf32> to vector<16x128xf32>
    %c15 = arith.constant 15 : index
    %c0_37 = arith.constant 0 : index
    %125 = vector.load %arg3[%c15, %c0_37] : memref<25x128xf32, #tpu.memory_space<vmem>>, vector<1x128xf32>
    %126 = vector.broadcast %125 : vector<1x128xf32> to vector<16x128xf32>
    %127 = arith.mulf %124, %126 : vector<16x128xf32>
    %128 = arith.addf %123, %127 : vector<16x128xf32>
    %129 = vector.extract_strided_slice %1 {offsets = [3, 8], sizes = [16, 128], strides = [1, 1]} : vector<20x160xf32> to vector<16x128xf32>
    %c16 = arith.constant 16 : index
    %c0_38 = arith.constant 0 : index
    %130 = vector.load %arg3[%c16, %c0_38] : memref<25x128xf32, #tpu.memory_space<vmem>>, vector<1x128xf32>
    %131 = vector.broadcast %130 : vector<1x128xf32> to vector<16x128xf32>
    %132 = arith.mulf %129, %131 : vector<16x128xf32>
    %133 = arith.addf %128, %132 : vector<16x128xf32>
    %134 = vector.extract_strided_slice %1 {offsets = [3, 16], sizes = [16, 128], strides = [1, 1]} : vector<20x160xf32> to vector<16x128xf32>
    %c17 = arith.constant 17 : index
    %c0_39 = arith.constant 0 : index
    %135 = vector.load %arg3[%c17, %c0_39] : memref<25x128xf32, #tpu.memory_space<vmem>>, vector<1x128xf32>
    %136 = vector.broadcast %135 : vector<1x128xf32> to vector<16x128xf32>
    %137 = arith.mulf %134, %136 : vector<16x128xf32>
    %138 = arith.addf %133, %137 : vector<16x128xf32>
    %139 = vector.extract_strided_slice %1 {offsets = [3, 24], sizes = [16, 128], strides = [1, 1]} : vector<20x160xf32> to vector<16x128xf32>
    %c18 = arith.constant 18 : index
    %c0_40 = arith.constant 0 : index
    %140 = vector.load %arg3[%c18, %c0_40] : memref<25x128xf32, #tpu.memory_space<vmem>>, vector<1x128xf32>
    %141 = vector.broadcast %140 : vector<1x128xf32> to vector<16x128xf32>
    %142 = arith.mulf %139, %141 : vector<16x128xf32>
    %143 = arith.addf %138, %142 : vector<16x128xf32>
    %144 = vector.extract_strided_slice %1 {offsets = [3, 32], sizes = [16, 128], strides = [1, 1]} : vector<20x160xf32> to vector<16x128xf32>
    %c19 = arith.constant 19 : index
    %c0_41 = arith.constant 0 : index
    %145 = vector.load %arg3[%c19, %c0_41] : memref<25x128xf32, #tpu.memory_space<vmem>>, vector<1x128xf32>
    %146 = vector.broadcast %145 : vector<1x128xf32> to vector<16x128xf32>
    %147 = arith.mulf %144, %146 : vector<16x128xf32>
    %148 = arith.addf %143, %147 : vector<16x128xf32>
    %149 = vector.extract_strided_slice %1 {offsets = [4, 0], sizes = [16, 128], strides = [1, 1]} : vector<20x160xf32> to vector<16x128xf32>
    %c20 = arith.constant 20 : index
    %c0_42 = arith.constant 0 : index
    %150 = vector.load %arg3[%c20, %c0_42] : memref<25x128xf32, #tpu.memory_space<vmem>>, vector<1x128xf32>
    %151 = vector.broadcast %150 : vector<1x128xf32> to vector<16x128xf32>
    %152 = arith.mulf %149, %151 : vector<16x128xf32>
    %153 = arith.addf %148, %152 : vector<16x128xf32>
    %154 = vector.extract_strided_slice %1 {offsets = [4, 8], sizes = [16, 128], strides = [1, 1]} : vector<20x160xf32> to vector<16x128xf32>
    %c21 = arith.constant 21 : index
    %c0_43 = arith.constant 0 : index
    %155 = vector.load %arg3[%c21, %c0_43] : memref<25x128xf32, #tpu.memory_space<vmem>>, vector<1x128xf32>
    %156 = vector.broadcast %155 : vector<1x128xf32> to vector<16x128xf32>
    %157 = arith.mulf %154, %156 : vector<16x128xf32>
    %158 = arith.addf %153, %157 : vector<16x128xf32>
    %159 = vector.extract_strided_slice %1 {offsets = [4, 16], sizes = [16, 128], strides = [1, 1]} : vector<20x160xf32> to vector<16x128xf32>
    %c22 = arith.constant 22 : index
    %c0_44 = arith.constant 0 : index
    %160 = vector.load %arg3[%c22, %c0_44] : memref<25x128xf32, #tpu.memory_space<vmem>>, vector<1x128xf32>
    %161 = vector.broadcast %160 : vector<1x128xf32> to vector<16x128xf32>
    %162 = arith.mulf %159, %161 : vector<16x128xf32>
    %163 = arith.addf %158, %162 : vector<16x128xf32>
    %164 = vector.extract_strided_slice %1 {offsets = [4, 24], sizes = [16, 128], strides = [1, 1]} : vector<20x160xf32> to vector<16x128xf32>
    %c23 = arith.constant 23 : index
    %c0_45 = arith.constant 0 : index
    %165 = vector.load %arg3[%c23, %c0_45] : memref<25x128xf32, #tpu.memory_space<vmem>>, vector<1x128xf32>
    %166 = vector.broadcast %165 : vector<1x128xf32> to vector<16x128xf32>
    %167 = arith.mulf %164, %166 : vector<16x128xf32>
    %168 = arith.addf %163, %167 : vector<16x128xf32>
    %169 = vector.extract_strided_slice %1 {offsets = [4, 32], sizes = [16, 128], strides = [1, 1]} : vector<20x160xf32> to vector<16x128xf32>
    %c24 = arith.constant 24 : index
    %c0_46 = arith.constant 0 : index
    %170 = vector.load %arg3[%c24, %c0_46] : memref<25x128xf32, #tpu.memory_space<vmem>>, vector<1x128xf32>
    %171 = vector.broadcast %170 : vector<1x128xf32> to vector<16x128xf32>
    %172 = arith.mulf %169, %171 : vector<16x128xf32>
    %173 = arith.addf %168, %172 : vector<16x128xf32>
    %c0_47 = arith.constant 0 : index
    %c0_48 = arith.constant 0 : index
    %174 = vector.load %arg4[%c0_47, %c0_48] : memref<128x128xf32, #tpu.memory_space<vmem>>, vector<128x128xf32>
    %cst_49 = arith.constant dense<0.000000e+00> : vector<16x128xf32>
    %175 = tpu.matmul %47, %174, %cst_49 {dimension_numbers = #tpu.dot_dimension_numbers<[1], [0], [0], [1], [0, 0, 1, 1], [], []>} : vector<16x128xf32>, vector<128x128xf32>, vector<16x128xf32> -> vector<16x128xf32>
    %c0_50 = arith.constant 0 : index
    %c0_51 = arith.constant 0 : index
    %176 = vector.load %arg6[%c0_50, %c0_51] : memref<2x128xf32, #tpu.memory_space<vmem>>, vector<1x128xf32>
    %177 = vector.broadcast %176 : vector<1x128xf32> to vector<16x128xf32>
    %178 = arith.addf %175, %177 : vector<16x128xf32>
    %cst_52 = arith.constant 0.000000e+00 : f32
    %179 = vector.broadcast %cst_52 : f32 to vector<16x128xf32>
    %180 = arith.maximumf %178, %179 : vector<16x128xf32>
    %c0_53 = arith.constant 0 : index
    %c0_54 = arith.constant 0 : index
    %181 = vector.load %arg5[%c0_53, %c0_54] : memref<128x128xf32, #tpu.memory_space<vmem>>, vector<128x128xf32>
    %cst_55 = arith.constant dense<0.000000e+00> : vector<16x128xf32>
    %182 = tpu.matmul %173, %181, %cst_55 {dimension_numbers = #tpu.dot_dimension_numbers<[1], [0], [0], [1], [0, 0, 1, 1], [], []>} : vector<16x128xf32>, vector<128x128xf32>, vector<16x128xf32> -> vector<16x128xf32>
    %c1_56 = arith.constant 1 : index
    %c0_57 = arith.constant 0 : index
    %183 = vector.load %arg6[%c1_56, %c0_57] : memref<2x128xf32, #tpu.memory_space<vmem>>, vector<1x128xf32>
    %184 = vector.broadcast %183 : vector<1x128xf32> to vector<16x128xf32>
    %185 = arith.addf %182, %184 : vector<16x128xf32>
    %cst_58 = arith.constant 0.000000e+00 : f32
    %186 = vector.broadcast %cst_58 : f32 to vector<16x128xf32>
    %187 = arith.maximumf %185, %186 : vector<16x128xf32>
    %188 = arith.addf %180, %187 : vector<16x128xf32>
    %c0_59 = arith.constant 0 : index
    %c0_60 = arith.constant 0 : index
    %189 = vector.load %arg7[%c0_59, %c0_60] : memref<32x16xf32, #tpu.memory_space<vmem>>, vector<32x16xf32>
    %cst_61 = arith.constant dense<0.000000e+00> : vector<32x128xf32>
    %190 = tpu.matmul %189, %188, %cst_61 {dimension_numbers = #tpu.dot_dimension_numbers<[1], [0], [0], [1], [0, 0, 1, 1], [], []>} : vector<32x16xf32>, vector<16x128xf32>, vector<32x128xf32> -> vector<32x128xf32>
    %c0_62 = arith.constant 0 : index
    %c0_63 = arith.constant 0 : index
    %191 = vector.load %arg8[%c0_62, %c0_63] : memref<128x256xf32, #tpu.memory_space<vmem>>, vector<128x256xf32>
    %cst_64 = arith.constant dense<0.000000e+00> : vector<32x256xf32>
    %192 = tpu.matmul %190, %191, %cst_64 {dimension_numbers = #tpu.dot_dimension_numbers<[1], [0], [0], [1], [0, 0, 1, 1], [], []>} : vector<32x128xf32>, vector<128x256xf32>, vector<32x256xf32> -> vector<32x256xf32>
    %c0_65 = arith.constant 0 : index
    %c0_66 = arith.constant 0 : index
    %c0_67 = arith.constant 0 : index
    %193 = vector.load %arg9[%c0_65, %c0_66, %c0_67] : memref<1x32x256xf32, #tpu.memory_space<vmem>>, vector<1x32x256xf32>
    %194 = vector.shape_cast %193 : vector<1x32x256xf32> to vector<32x256xf32>
    %195 = vector.shape_cast %192 : vector<32x256xf32> to vector<1x32x256xf32>
    tpu.vector_store %arg9[%c0_65, %c0_66, %c0_67], %195 {strides = array<i32>} : memref<1x32x256xf32, #tpu.memory_space<vmem>>, vector<1x32x256xf32>,
    return
  }
  func.func @transform_0(%arg0: i32) -> (i32, i32, i32) {
    %c0_i32 = arith.constant 0 : i32
    %c0_i32_0 = arith.constant 0 : i32
    %c0_i32_1 = arith.constant 0 : i32
    return %arg0, %c0_i32, %c0_i32_0 : i32, i32, i32
  }
  func.func @transform_1(%arg0: i32) -> (i32, i32) {
    %c0_i32 = arith.constant 0 : i32
    %c0_i32_0 = arith.constant 0 : i32
    %c0_i32_1 = arith.constant 0 : i32
    return %c0_i32, %c0_i32_0 : i32, i32
  }
  func.func @transform_2(%arg0: i32) -> (i32, i32) {
    %c0_i32 = arith.constant 0 : i32
    %c0_i32_0 = arith.constant 0 : i32
    %c0_i32_1 = arith.constant 0 : i32
    return %c0_i32, %c0_i32_0 : i32, i32
  }
  func.func @transform_3(%arg0: i32) -> (i32, i32) {
    %c0_i32 = arith.constant 0 : i32
    %c0_i32_0 = arith.constant 0 : i32
    %c0_i32_1 = arith.constant 0 : i32
    return %c0_i32, %c0_i32_0 : i32, i32
  }
  func.func @transform_4(%arg0: i32) -> (i32, i32) {
    %c0_i32 = arith.constant 0 : i32
    %c0_i32_0 = arith.constant 0 : i32
    %c0_i32_1 = arith.constant 0 : i32
    return %c0_i32, %c0_i32_0 : i32, i32
  }
  func.func @transform_5(%arg0: i32) -> (i32, i32) {
    %c0_i32 = arith.constant 0 : i32
    %c0_i32_0 = arith.constant 0 : i32
    %c0_i32_1 = arith.constant 0 : i32
    return %c0_i32, %c0_i32_0 : i32, i32
  }
  func.func @transform_6(%arg0: i32) -> (i32, i32) {
    %c0_i32 = arith.constant 0 : i32
    %c0_i32_0 = arith.constant 0 : i32
    %c0_i32_1 = arith.constant 0 : i32
    return %c0_i32, %c0_i32_0 : i32, i32
  }
  func.func @transform_7(%arg0: i32) -> (i32, i32) {
    %c0_i32 = arith.constant 0 : i32
    %c0_i32_0 = arith.constant 0 : i32
    %c0_i32_1 = arith.constant 0 : i32
    return %c0_i32, %c0_i32_0 : i32, i32
  }
  func.func @transform_8(%arg0: i32) -> (i32, i32, i32) {
    %c0_i32 = arith.constant 0 : i32
    %c0_i32_0 = arith.constant 0 : i32
    %c0_i32_1 = arith.constant 0 : i32
    return %arg0, %c0_i32, %c0_i32_0 : i32, i32, i32
  }
}

</mosaic_0001>

<bundles_post_ra>
// kernel: tpu_custom_call.1
= control target key start
LH: loop header
LB: loop body
LE: loop exit
PB: predicated region body
PF: predicated region fallthrough
CT: control target
= control target key end

     0   :  { %13 = vsyncpa [#allocation3], 0  ;;  %s4041_s0 = inlined_call_operand.vmem [shape: f32[2,20,160], index: 0, kind: input, shape index: {}]   ;;  %s4042_s1 = inlined_call_operand.vmem [shape: f32[9,128], index: 1, kind: input, shape index: {}]   ;;  %s4043_s2 = inlined_call_operand.vmem [shape: f32[25,128], index: 2, kind: input, shape index: {}]   ;;  %s4044_s3 = inlined_call_operand.vmem [shape: f32[128,128], index: 3, kind: input, shape index: {}]   ;;  %s4045_s4 = inlined_call_operand.hbm [shape: f32[128,128], index: 4, kind: input, shape index: {}]   ;;  %s4046_s5 = inlined_call_operand.vmem [shape: f32[2,128], index: 5, kind: input, shape index: {}]   ;;  %s4047_s6 = inlined_call_operand.vmem [shape: f32[32,16], index: 6, kind: input, shape index: {}]   ;;  %s4048_s7 = inlined_call_operand.hbm [shape: f32[128,256], index: 7, kind: input, shape index: {}]   ;;  %s4049_s8 = inlined_call_operand.hbm [shape: f32[2,32,256], index: 8, kind: output, shape index: {}]  }
   0x1   :  { %14 = vsyncpa [#allocation6], 0 }
   0x2   :  { %15 = vsyncpa [#allocation4], 0 }
   0x3   :  { %17 = vsyncpa [#allocation4 + $0x1], 0  ;;  %s2724_s27 = smov 0   ;;  %s2726_s28 = smov 0  }
   0x4   :  { %s2728_s29 = smov 0   ;;  %s2730_s30 = smov 0  }
   0x5 LB: > { %s2745_s9 = sadd.s32 4294967295, %s2660_s30   ;;  %s2271_s10 = sadd.s32 4294967294, %s2660_s30   ;;  %s2660_s30 = sphi %s2730_s30, %s4114_s30   ;;  %s2656_s29 = sphi %s2728_s29, %s4113_s29   ;;  %s2652_s28 = sphi %s2726_s28, %s4112_s28   ;;  %s2648_s27 = sphi %s2724_s27, %s4111_s27  }
   0x6   : > { %s2749_s11 = sadd.s32 1, %s2660_s30   ;;  %s203_s12 = sadd.s32 1, %s2656_s29 }
   0x7   : > { %s200_s13 = ssub.s32 %s2660_s30, %s2749_s11  ;;  %p213_p0 = scmp.ne.s32.totalorder %s2656_s29, %s2652_s28 }
   0x8   : > { %p201_p1 = scmp.eq.s32.totalorder %s200_s13, 0  ;;  %p214_p2 = scmp.eq.s32.totalorder %s2745_s9, 1 }
   0x9   : > { %p219_p3 = scmp.ne.s32.totalorder %s2652_s28, %s2648_s27  ;;  %p220_p4 = scmp.eq.s32.totalorder %s2271_s10, 1 }
   0xa   : > { %s2760_s14 = scalar_select %p201_p1, %s2656_s29, %s203_s12  }
   0xb   : > { %p2762_p5 = por %p214_p2, %p213_p0  ;;  %p2766_p6 = por %p220_p4, %p219_p3 }
   0xc   : > { %p2272_p7 = scmp.ge.s32.totalorder %s2660_s30, 1  ;;  %p227_p8 = scmp.lt.s32.totalorder %s2660_s30, 3 }
   0xd   : > { %s4061_s16 = scalar_select %p2766_p6, 1, 0 }
   0xe   : > { %p4050_p9 = scmp.eq.s32.totalorder %s2745_s9, 0  ;;  %p2773_p10 = pnand %p2272_p7, %p227_p8 }
   0xf   : > { %s2662_s18 = smov [#allocation2]   ;;  %s2663_s21 = smov [#allocation5]  }
  0x10   : > { %s248_s19 = sshll.u32 %s2662_s18, 4  ;;  %p2460_p11 = pneg %p2773_p10  ;;  %s249_s19 = int_to_ptr.vmem [resolvable:$true] %s248_s19 }
  0x11   : > { %s267_s22 = sshll.u32 %s2663_s21, 4  ;;  %s2551_s23 = scalar_lea.vmem %s249_s19, 2048  ;;  %s268_s22 = int_to_ptr.vmem [resolvable:$true] %s267_s22 }
  0x12   : > { %p2781_p12 = pnand %p4050_p9, %p2460_p11  ;;  %p2552_p0 = scmp.ne.s32.totalorder %s249_s19, %s2551_s23 }
  0x13   : > { %p2559_p3 = scmp.lt.s32.totalorder %s249_s19, %s249_s19  ;;  %p2560_p4 = scmp.lt.s32.totalorder %s2551_s23, %s2551_s23 }
  0x14   : > { %p2542_p13 = pneg %p2781_p12 }
  0x15   : > { %p2561_p7 = por %p2560_p4, %p2559_p3 }
  0x16   : > { %p2554_p1 = pnand %p2552_p0, %p2542_p13 }
  0x18   : > { %p2555_p2 = pneg %p2554_p1 }
  0x1a   : > { %p2562_p8 = pnand %p2561_p7, %p2555_p2 }
  0x1c   : > { %2565 = shalt.err (!%p2562_p8)
}
  0x1d   : > { %s2664_s24 = smov 128   ;;  %s2665_s25 = smov 8  }
  0x1e   : > { %2463 = dma.hbm_to_vmem [thread:$0]  (!%p2781_p12), %s4045_s4, 2048, %s249_s19, [#allocation3], %s2664_s24, %s2664_s24, %s2665_s25  }
  0x1f   : > { %s2577_s12 = scalar_lea.vmem %s268_s22, 4096  ;;  %p2585_p9 = scmp.lt.s32.totalorder %s268_s22, %s268_s22 }
  0x20   : > { %p2578_p11 = scmp.ne.s32.totalorder %s268_s22, %s2577_s12  ;;  %p2586_p6 = scmp.lt.s32.totalorder %s2577_s12, %s2577_s12 }
  0x22   : > { %p2580_p0 = pnand %p2578_p11, %p2542_p13  ;;  %p2587_p3 = por %p2586_p6, %p2585_p9 }
  0x24   : > { %p2581_p1 = pneg %p2580_p0 }
  0x26   : > { %p2588_p2 = pnand %p2587_p3, %p2581_p1 }
  0x28   : > { %2591 = shalt.err (!%p2588_p2)
}
  0x29   : > { %s2666_s13 = smov 256   ;;  %s2667_s18 = smov 16  }
  0x2a   : > { %2466 = dma.hbm_to_vmem [thread:$0]  (!%p2781_p12), %s4048_s7, 4096, %s268_s22, [#allocation6], %s2666_s13, %s2666_s13, %s2667_s18  }
  0x2b   : > { %291 = sbr.rel (%p2773_p10) target bundleno = 1142 (0x476), region = 52 }
  0x30   : > { %p4064_p4 = scmp.eq.s32.totalorder %s2745_s9, 0 }
  0x32   : > { %2635 = dma.done.wait (%p4064_p4), [#allocation3], 2048   ;;  %p4065_p13 = pmov %p4064_p4 }
  0x33   : > { %p4066_p6 = pmov %p4064_p4 }
  0x34   : > { %2637 = vsyncadd (%p4065_p13), [#allocation3], 4294965248 }
  0x35   : > { %2639 = dma.done.wait (%p4066_p6), [#allocation6], 4096   ;;  %p4067_p9 = pmov %p4064_p4 }
  0x36   : > { %v2282_v0 = vld [vmem:[%s4042_s1 + $0x1] ss:$0 sm:$0xff]  ;;  %s2668_s22 = smov 16   ;;  %v2285_v1 = vld [vmem:[%s4042_s1 + $0x4] ss:$0 sm:$0xff]  ;;  %s2669_s13 = smov 24  }
  0x37   : > { %2641 = vsyncadd (%p4067_p9), [#allocation6], 4294963200  ;;  %367 = vrot.lane.b32.xlu0 %v2282_v0, %s2668_s22  ;;  %v2283_v2 = vld [vmem:[%s4042_s1 + $0x2] ss:$0 sm:$0xff]  ;;  %509 = vrot.lane.b32.xlu1 %v2285_v1, %s2668_s22  ;;  %v2286_v3 = vld [vmem:[%s4042_s1 + $0x5] ss:$0 sm:$0xff] }
  0x38   : > { %v2288_v4 = vld [vmem:[%s4042_s1 + $0x7] ss:$0 sm:$0xff]  ;;  %v2289_v5 = vld [vmem:[%s4042_s1 + $0x8] ss:$0 sm:$0xff]  ;;  %v2281_v6 = vld [vmem:[%s4042_s1] ss:$0 sm:$0xff] }
  0x39   : > { %v2284_v7 = vld [vmem:[%s4042_s1 + $0x3] ss:$0 sm:$0xff]  ;;  %s2670_s26 = smov 8   ;;  %v2291_v8 = vld [vmem:[%s4043_s2 + $0x1] ss:$0 sm:$0xff]  ;;  %s2671_s18 = smov 32  }
  0x3a   : > { %v2292_v9 = vld [vmem:[%s4043_s2 + $0x2] ss:$0 sm:$0xff]  ;;  %v2293_v10 = vld [vmem:[%s4043_s2 + $0x3] ss:$0 sm:$0xff]  ;;  %v2287_v11 = vld [vmem:[%s4042_s1 + $0x6] ss:$0 sm:$0xff] }
  0x3b   : > { %416 = vrot.lane.b32.xlu0 %v2283_v2, %s2669_s13  ;;  %567 = vrot.lane.b32.xlu1 %v2286_v3, %s2669_s13  ;;  %v2294_v12 = vld [vmem:[%s4043_s2 + $0x4] ss:$0 sm:$0xff]  ;;  %v2296_v13 = vld [vmem:[%s4043_s2 + $0x6] ss:$0 sm:$0xff]  ;;  %p329_p10 = scmp.lt.s32.totalorder %s2745_s9, 1  ;;  %vm480_vm0 = vcmask 1046528  }
  0x3c   : > { %v2297_v14 = vld [vmem:[%s4043_s2 + $0x7] ss:$0 sm:$0xff]  ;;  %v2298_v15 = vld [vmem:[%s4043_s2 + $0x8] ss:$0 sm:$0xff]  ;;  %v2299_v16 = vld [vmem:[%s4043_s2 + $0x9] ss:$0 sm:$0xff] }
  0x3d   : > { %v2301_v17 = vld [vmem:[%s4043_s2 + $0xb] ss:$0 sm:$0xff]  ;;  %v2302_v18 = vld [vmem:[%s4043_s2 + $0xc] ss:$0 sm:$0xff]  ;;  %v2303_v19 = vld [vmem:[%s4043_s2 + $0xd] ss:$0 sm:$0xff] }
  0x3e   : > { %v2304_v20 = vld [vmem:[%s4043_s2 + $0xe] ss:$0 sm:$0xff]  ;;  %v2306_v21 = vld [vmem:[%s4043_s2 + $0x10] ss:$0 sm:$0xff]  ;;  %v2307_v22 = vld [vmem:[%s4043_s2 + $0x11] ss:$0 sm:$0xff] }
  0x3f   : > { %669 = vrot.lane.b32.xlu0 %v2288_v4, %s2668_s22  ;;  %727 = vrot.lane.b32.xlu1 %v2289_v5, %s2669_s13  ;;  %v2308_v23 = vld [vmem:[%s4043_s2 + $0x12] ss:$0 sm:$0xff]  ;;  %v2309_v24 = vld [vmem:[%s4043_s2 + $0x13] ss:$0 sm:$0xff]  ;;  %vm640_vm1 = vcmask 1045504   ;;  %s2674_s10 = smov 104  }
  0x40   : > { %v2311_v25 = vld [vmem:[%s4043_s2 + $0x15] ss:$0 sm:$0xff]  ;;  %v2312_v26 = vld [vmem:[%s4043_s2 + $0x16] ss:$0 sm:$0xff]  ;;  %v2313_v27 = vld [vmem:[%s4043_s2 + $0x17] ss:$0 sm:$0xff] }
  0x41   : > { %v2314_v28 = vld [vmem:[%s4043_s2 + $0x18] ss:$0 sm:$0xff]  ;;  %s2675_s12 = smov 96   ;;  %vm1325_vm2 = vcmask 1044480   ;;  %vm394_vm3 = vcmask 982016   ;;  %vm443_vm4 = vcmask 916480  }
  0x42   : > { %vm875_vm5 = vcmask 850944   ;;  %vm1526_vm6 = vcmask 1043456   ;;  %vm907_vm7 = vcmask 785408   ;;  %vm1946_vm8 = vcmask 130048   ;;  %s326_s19 = sand.u32 1, %s2652_s28   ;;  %s2326_s17 = sshll.u32 %s2745_s9, 10 }
  0x43   : > { %346 = vrot.lane.b32.xlu0 %v2281_v6, %s2670_s26  ;;  %465 = vrot.lane.b32.xlu1 %v2284_v7, %s2670_s26 }
  0x47   : > { %794 = vrot.lane.b32.xlu0 %v2291_v8, %s2670_s26  ;;  %825 = vrot.lane.b32.xlu1 %v2292_v9, %s2668_s22 }
  0x4b   : > { %856 = vrot.lane.b32.xlu0 %v2293_v10, %s2669_s13  ;;  %625 = vrot.lane.b32.xlu1 %v2287_v11, %s2670_s26 }
  0x4f   : > { %888 = vrot.lane.b32.xlu0 %v2294_v12, %s2671_s18  ;;  %940 = vrot.lane.b32.xlu1 %v2296_v13, %s2670_s26 }
  0x53   : > { %985 = vrot.lane.b32.xlu0 %v2297_v14, %s2668_s22  ;;  %1030 = vrot.lane.b32.xlu1 %v2298_v15, %s2669_s13 }
  0x57   : > { %1075 = vrot.lane.b32.xlu0 %v2299_v16, %s2671_s18  ;;  %1140 = vrot.lane.b32.xlu1 %v2301_v17, %s2670_s26 }
  0x5b   : > { %1185 = vrot.lane.b32.xlu0 %v2302_v18, %s2668_s22  ;;  %1230 = vrot.lane.b32.xlu1 %v2303_v19, %s2669_s13 }
  0x5f   : > { %1275 = vrot.lane.b32.xlu0 %v2304_v20, %s2671_s18  ;;  %1341 = vrot.lane.b32.xlu1 %v2306_v21, %s2670_s26 }
  0x63   : > { %1386 = vrot.lane.b32.xlu0 %v2307_v22, %s2668_s22  ;;  %1431 = vrot.lane.b32.xlu1 %v2308_v23, %s2669_s13 }
  0x67   : > { %1476 = vrot.lane.b32.xlu0 %v2309_v24, %s2671_s18  ;;  %1542 = vrot.lane.b32.xlu1 %v2311_v25, %s2670_s26  ;;  %s330_s26 = scalar_select %p329_p10, %s2745_s9, 1 }
  0x68   : > { %s2677_s9 = smov [#allocation7]  }
  0x69   : > { %s2449_s20 = smul.u32 48, %s330_s26  ;;  %s2279_s26 = sshll.u32 %s326_s19, 6 }
  0x6a   : > { %s2596_s21 = sshll.u32 %s2677_s9, 4  ;;  %s2597_s21 = int_to_ptr.vmem [resolvable:$false] %s2596_s21 }
  0x6b   : > { %1587 = vrot.lane.b32.xlu0 %v2312_v26, %s2668_s22  ;;  %1632 = vrot.lane.b32.xlu1 %v2313_v27, %s2669_s13  ;;  %s2934_s25 = scalar_lea.vmem %s4041_s0, %s2449_s20  ;;  %s2672_s13 = smov 120  }
  0x6c   : > { %v2937_v29 = vld [vmem:[%s2934_s25 + $0x8] sm:$0xff]  ;;  %v2940_v30 = vld [vmem:[%s2934_s25] sm:$0xff]  ;;  %v2945_v34 = vld [vmem:[%s2934_s25 + $0x10] sm:$0xff]  ;;  %s2598_s23 = scalar_lea.vmem %s2597_s21, 2048 }
  0x6d   : > { %v2948_v35 = vld [vmem:[%s2934_s25 + $0x18] sm:$0xff]  ;;  %v2955_v39 = vld [vmem:[%s2934_s25 + $0x20] sm:$0xf]  ;;  %v2958_v40 = vld [vmem:[%s2934_s25 + $0x28] sm:$0xf] }
  0x6f   : > { %1677 = vrot.lane.b32.xlu0 %v2314_v28, %s2671_s18  ;;  %s2673_s18 = smov 112  }
  0xa9   : > { %v368_v31 = vpop.permute.xlu0 %367  ;;  %v510_v47 = vpop.permute.xlu1 %509 }
  0xaa   : > { %v371_v32 = vmul.f32 %v368_v31, %v2937_v29  ;;  %v370_v33 = vmul.f32 %v368_v31, %v2940_v30  ;;  %v373_v37 = vmul.f32 %v368_v31, %v2948_v35  ;;  %v372_v38 = vmul.f32 %v368_v31, %v2945_v34 }
  0xab   : > { %v374_v42 = vmul.f32 %v368_v31, %v2955_v39  ;;  %v375_v43 = vmul.f32 %v368_v31, %v2958_v40  ;;  %v516_v50 = vmul.f32 %v510_v47, %v2955_v39  ;;  %v517_v58 = vmul.f32 %v510_v47, %v2958_v40 }
  0xac   : > { %384 = vrot.lane.b32.xlu0 %v371_v32, %s2672_s13  ;;  %382 = vrot.lane.b32.xlu1 %v370_v33, %s2672_s13  ;;  %v513_v4 = vmul.f32 %v510_v47, %v2937_v29  ;;  %v515_v5 = vmul.f32 %v510_v47, %v2948_v35  ;;  %v512_v11 = vmul.f32 %v510_v47, %v2940_v30 }
  0xad   : > { %v417_v36 = vpop.permute.xlu0 %416  ;;  %v568_v52 = vpop.permute.xlu1 %567  ;;  %v530_v55 = vrot.slane %v516_v50, 1  ;;  %v532_v61 = vrot.slane %v517_v58, 1  ;;  %v514_v12 = vmul.f32 %v510_v47, %v2945_v34 }
  0xae   : > { %v420_v44 = vmul.f32 %v417_v36, %v2937_v29  ;;  %v419_v45 = vmul.f32 %v417_v36, %v2940_v30  ;;  %v422_v48 = vmul.f32 %v417_v36, %v2948_v35  ;;  %v421_v49 = vmul.f32 %v417_v36, %v2945_v34 }
  0xaf   : > { %v424_v53 = vmul.f32 %v417_v36, %v2958_v40  ;;  %v423_v54 = vmul.f32 %v417_v36, %v2955_v39  ;;  %v2988_v57 = vmul.f32 %v568_v52, %v2955_v39  ;;  %v575_v63 = vmul.f32 %v568_v52, %v2958_v40 }
  0xb0   : > { %388 = vrot.lane.b32.xlu0 %v373_v37, %s2672_s13  ;;  %386 = vrot.lane.b32.xlu1 %v372_v38, %s2672_s13  ;;  %v527_v9 = vrot.slane %v513_v4, 1  ;;  %v528_v10 = vrot.slane %v515_v5, 1  ;;  %v571_v14 = vmul.f32 %v568_v52, %v2937_v29  ;;  %v573_v15 = vmul.f32 %v568_v52, %v2948_v35 }
  0xb1   : > { %v2962_v41 = vpop.permute.xlu0 %669  ;;  %v588_v59 = vrot.slane %v2988_v57, 1  ;;  %v2994_v60 = vpop.permute.xlu1 %727  ;;  %v590_v2 = vrot.slane %v575_v63, 1  ;;  %v524_v17 = vrot.slane %v512_v11, 1  ;;  %v525_v18 = vrot.slane %v514_v12, 1 }
  0xb2   : > { %v2998_v62 = vmul.f32 %v2962_v41, %v2955_v39  ;;  %v3007_v0 = vmul.f32 %v2994_v60, %v2958_v40  ;;  %v677_v3 = vmul.f32 %v2962_v41, %v2958_v40  ;;  %v3021_v8 = vmul.f32 %v2994_v60, %v2955_v39 }
  0xb3   : > { %v529_v16 = vsel %vm480_vm0, %v527_v9, %v528_v10  ;;  %v585_v19 = vrot.slane %v571_v14, 1  ;;  %v586_v20 = vrot.slane %v573_v15, 1  ;;  %v533_v21 = vsel %vm480_vm0, %v528_v10, %v532_v61 }
  0xb4   : > { %390 = vrot.lane.b32.xlu0 %v374_v42, %s2672_s13  ;;  %392 = vrot.lane.b32.xlu1 %v375_v43, %s2672_s13  ;;  %v690_v1 = vrot.slane %v2998_v62, 2  ;;  %v750_v6 = vrot.slane %v3007_v0, 2  ;;  %v692_v7 = vrot.slane %v677_v3, 2  ;;  %v748_v13 = vrot.slane %v3021_v8, 2 }
  0xb5   : > { %v2970_v46 = vpop.permute.xlu0 %346  ;;  %v526_v22 = vsel %vm480_vm0, %v524_v17, %v525_v18  ;;  %v570_v23 = vmul.f32 %v568_v52, %v2940_v30  ;;  %v572_v24 = vmul.f32 %v568_v52, %v2945_v34  ;;  %v587_v25 = vsel %vm480_vm0, %v585_v19, %v586_v20  ;;  %v3051_v33 = vpop.permute.xlu1 %465 }
  0xb6   : > { %v531_v26 = vsel %vm480_vm0, %v525_v18, %v530_v55  ;;  %v673_v31 = vmul.f32 %v2962_v41, %v2937_v29  ;;  %v675_v32 = vmul.f32 %v2962_v41, %v2948_v35  ;;  %v591_v36 = vsel %vm480_vm0, %v586_v20, %v590_v2 }
  0xb7   : > { %v582_v27 = vrot.slane %v570_v23, 1  ;;  %v583_v28 = vrot.slane %v572_v24, 1  ;;  %v672_v37 = vmul.f32 %v2962_v41, %v2940_v30  ;;  %v732_v47 = vmul.f32 %v2994_v60, %v2945_v34 }
  0xb8   : > { %433 = vrot.lane.b32.xlu0 %v420_v44, %s2673_s18  ;;  %431 = vrot.lane.b32.xlu1 %v419_v45, %s2673_s18  ;;  %v687_v42 = vrot.slane %v673_v31, 2  ;;  %v688_v43 = vrot.slane %v675_v32, 2  ;;  %v674_v44 = vmul.f32 %v2962_v41, %v2945_v34  ;;  %v730_v45 = vmul.f32 %v2994_v60, %v2940_v30 }
  0xb9   : > { %v2979_v51 = vpop.permute.xlu0 %794  ;;  %v584_v38 = vsel %vm480_vm0, %v582_v27, %v583_v28  ;;  %v589_v52 = vsel %vm480_vm0, %v583_v28, %v588_v59  ;;  %v684_v41 = vrot.slane %v672_v37, 2  ;;  %v743_v58 = vrot.slane %v732_v47, 2 }
  0xba   : > { %v797_v56 = vmul.f32 %v2979_v51, %v2940_v30  ;;  %v689_v50 = vsel %vm640_vm1, %v687_v42, %v688_v43  ;;  %v733_v57 = vmul.f32 %v2994_v60, %v2948_v35  ;;  %v798_v62 = vmul.f32 %v2979_v51, %v2937_v29 }
  0xbb   : > { %v749_v9 = vsel %vm640_vm1, %v743_v58, %v748_v13  ;;  %v800_v12 = vmul.f32 %v2979_v51, %v2948_v35 }
  0xbc   : > { %437 = vrot.lane.b32.xlu0 %v422_v48, %s2673_s18  ;;  %435 = vrot.lane.b32.xlu1 %v421_v49, %s2673_s18  ;;  %v826_v48 = vpop.permute.xlu1 %825  ;;  %v746_v5 = vrot.slane %v733_v57, 2 }
  0xbd   : > { %v857_v49 = vpop.permute.xlu0 %856  ;;  %v829_v0 = vmul.f32 %v826_v48, %v2937_v29 }
  0xbe   : > { %v860_v19 = vmul.f32 %v857_v49, %v2937_v29  ;;  %v859_v20 = vmul.f32 %v857_v49, %v2940_v30 }
  0xc0   : > { %441 = vrot.lane.b32.xlu0 %v424_v53, %s2673_s18  ;;  %439 = vrot.lane.b32.xlu1 %v423_v54, %s2673_s18  ;;  %v685_v53 = vrot.slane %v674_v44, 2  ;;  %v693_v54 = vsel %vm640_vm1, %v688_v43, %v692_v7 }
  0xc1   : > { %v889_v63 = vpop.permute.xlu0 %888 }
  0xc2   : > { %v691_v3 = vsel %vm640_vm1, %v685_v53, %v690_v1  ;;  %v893_v42 = vmul.f32 %v889_v63, %v2945_v34 }
  0xc4   : > { %542 = vrot.lane.b32.xlu0 %v530_v55, %s2672_s13  ;;  %805 = vrot.lane.b32.xlu1 %v797_v56, %s2672_s13  ;;  %v742_v55 = vrot.slane %v730_v45, 2  ;;  %v686_v56 = vsel %vm640_vm1, %v684_v41, %v685_v53 }
  0xc8   : > { %600 = vrot.lane.b32.xlu0 %v588_v59, %s2673_s18  ;;  %544 = vrot.lane.b32.xlu1 %v532_v61, %s2672_s13  ;;  %v731_v61 = vmul.f32 %v2994_v60, %v2937_v29  ;;  %v3079_v59 = vpop.permute.xlu1 %625 }
  0xca   : > { %v745_v4 = vrot.slane %v731_v61, 2 }
  0xcc   : > { %702 = vrot.lane.b32.xlu0 %v690_v1, %s2672_s13  ;;  %602 = vrot.lane.b32.xlu1 %v590_v2, %s2673_s18  ;;  %v744_v2 = vsel %vm640_vm1, %v742_v55, %v743_v58  ;;  %v941_v60 = vpop.permute.xlu1 %940  ;;  %v747_v10 = vsel %vm640_vm1, %v745_v4, %v746_v5  ;;  %v751_v1 = vsel %vm640_vm1, %v746_v5, %v750_v6 }
  0xcd   : > { %v944_v27 = vmul.f32 %v941_v60, %v2937_v29  ;;  %v946_v28 = vmul.f32 %v941_v60, %v2948_v35  ;;  %v943_v31 = vmul.f32 %v941_v60, %v2940_v30  ;;  %v945_v32 = vmul.f32 %v941_v60, %v2945_v34 }
  0xce   : > { %v948_v43 = vmul.f32 %v941_v60, %v2958_v40  ;;  %v947_v44 = vmul.f32 %v941_v60, %v2955_v39 }
  0xcf   : > { %v958_v45 = vrot.slane %v944_v27, 1  ;;  %v959_v47 = vrot.slane %v946_v28, 1 }
  0xd0   : > { %762 = vrot.lane.b32.xlu0 %v750_v6, %s2673_s18  ;;  %704 = vrot.lane.b32.xlu1 %v692_v7, %s2672_s13  ;;  %v3087_v7 = vpop.permute.xlu0 %985  ;;  %v3102_v8 = vpop.permute.xlu1 %1030  ;;  %v828_v6 = vmul.f32 %v826_v48, %v2940_v30  ;;  %v963_v41 = vrot.slane %v948_v43, 1  ;;  %v961_v53 = vrot.slane %v947_v44, 1 }
  0xd1   : > { %v991_v55 = vmul.f32 %v3087_v7, %v2948_v35  ;;  %v988_v61 = vmul.f32 %v3087_v7, %v2940_v30  ;;  %v990_v57 = vmul.f32 %v3087_v7, %v2945_v34  ;;  %v993_v4 = vmul.f32 %v3087_v7, %v2958_v40 }
  0xd3   : > { %v1004_v5 = vrot.slane %v991_v55, 1  ;;  %v1000_v60 = vrot.slane %v988_v61, 1 }
  0xd4   : > { %536 = vrot.lane.b32.xlu0 %v529_v16, %s2672_s13  ;;  %760 = vrot.lane.b32.xlu1 %v748_v13, %s2673_s18  ;;  %v3104_v11 = vpop.permute.xlu0 %1075  ;;  %v799_v13 = vmul.f32 %v2979_v51, %v2945_v34  ;;  %v3114_v14 = vpop.permute.xlu1 %1140  ;;  %v831_v16 = vmul.f32 %v826_v48, %v2948_v35  ;;  %v830_v51 = vmul.f32 %v826_v48, %v2945_v34  ;;  %v955_v48 = vrot.slane %v943_v31, 1 }
  0xd5   : > { %v1081_v43 = vmul.f32 %v3104_v11, %v2948_v35 }
  0xd7   : > { %v1094_v55 = vrot.slane %v1081_v43, 1 }
  0xd8   : > { %540 = vrot.lane.b32.xlu0 %v533_v21, %s2672_s13  ;;  %534 = vrot.lane.b32.xlu1 %v526_v22, %s2672_s13  ;;  %v3116_v15 = vpop.permute.xlu0 %1185  ;;  %v3124_v17 = vpop.permute.xlu1 %1230  ;;  %v862_v21 = vmul.f32 %v857_v49, %v2948_v35  ;;  %v861_v22 = vmul.f32 %v857_v49, %v2945_v34  ;;  %v956_v49 = vrot.slane %v945_v32, 1  ;;  %v1038_v32 = vmul.f32 %v3102_v8, %v2958_v40 }
  0xda   : > { %v957_v58 = vsel %vm480_vm0, %v955_v48, %v956_v49 }
  0xdc   : > { %594 = vrot.lane.b32.xlu0 %v587_v25, %s2673_s18  ;;  %538 = vrot.lane.b32.xlu1 %v531_v26, %s2672_s13  ;;  %v3126_v18 = vpop.permute.xlu0 %1275  ;;  %v3134_v23 = vpop.permute.xlu1 %1341  ;;  %v892_v25 = vmul.f32 %v889_v63, %v2937_v29  ;;  %v891_v26 = vmul.f32 %v889_v63, %v2940_v30 }
  0xe0   : > { %598 = vrot.lane.b32.xlu0 %v591_v36, %s2673_s18  ;;  %592 = vrot.lane.b32.xlu1 %v584_v38, %s2673_s18  ;;  %v3136_v24 = vpop.permute.xlu0 %1386  ;;  %v3148_v36 = vpop.permute.xlu1 %1431  ;;  %v894_v38 = vmul.f32 %v889_v63, %v2948_v35  ;;  %v964_v63 = vsel %vm480_vm0, %v959_v47, %v963_v41  ;;  %v1053_v41 = vrot.slane %v1038_v32, 1 }
  0xe4   : > { %696 = vrot.lane.b32.xlu0 %v689_v50, %s2672_s13  ;;  %596 = vrot.lane.b32.xlu1 %v589_v52, %s2673_s18  ;;  %v3150_v37 = vpop.permute.xlu0 %1476  ;;  %v3158_v50 = vpop.permute.xlu1 %1542 }
  0xe5   : > { %4068 = vst [vmem:[#allocation11_spill] sm:$0xff] %v3158_v50 }
  0xe8   : > { %700 = vrot.lane.b32.xlu0 %v693_v54, %s2672_s13  ;;  %694 = vrot.lane.b32.xlu1 %v686_v56, %s2672_s13  ;;  %v3160_v52 = vpop.permute.xlu0 %1587  ;;  %v989_v54 = vmul.f32 %v3087_v7, %v2937_v29  ;;  %v960_v56 = vsel %vm480_vm0, %v958_v45, %v959_v47  ;;  %v1078_v47 = vmul.f32 %v3104_v11, %v2940_v30 }
  0xe9   : > { %4069 = vst [vmem:[#allocation12_spill] sm:$0xff] %v3160_v52 }
  0xea   : > { %v1090_v61 = vrot.slane %v1078_v47, 1 }
  0xec   : > { %752 = vrot.lane.b32.xlu0 %v744_v2, %s2673_s18  ;;  %698 = vrot.lane.b32.xlu1 %v691_v3, %s2672_s13  ;;  %v962_v2 = vsel %vm480_vm0, %v956_v49, %v961_v53  ;;  %v1003_v3 = vrot.slane %v989_v54, 1 }
  0xf0   : > { %756 = vrot.lane.b32.xlu0 %v749_v9, %s2673_s18  ;;  %754 = vrot.lane.b32.xlu1 %v747_v10, %s2673_s18  ;;  %v1001_v9 = vrot.slane %v990_v57, 1  ;;  %v992_v10 = vmul.f32 %v3087_v7, %v2955_v39  ;;  %v1005_v7 = vsel %vm480_vm0, %v1003_v3, %v1004_v5 }
  0xf4   : > { %807 = vrot.lane.b32.xlu0 %v798_v62, %s2672_s13  ;;  %758 = vrot.lane.b32.xlu1 %v751_v1, %s2673_s18  ;;  %v3182_v62 = vpop.permute.xlu1 %1632  ;;  %v3184_v1 = vpop.permute.xlu0 %1677 }
  0xf5   : > { %4070 = vst [vmem:[#allocation13_spill] sm:$0xff] %v3182_v62  ;;  %4071 = vst [vmem:[#allocation14_spill] sm:$0xff] %v3184_v1 }
  0xf8   : > { %811 = vrot.lane.b32.xlu0 %v800_v12, %s2672_s13  ;;  %809 = vrot.lane.b32.xlu1 %v799_v13, %s2672_s13  ;;  %v1008_v12 = vrot.slane %v993_v4, 1  ;;  %v1034_v13 = vmul.f32 %v3102_v8, %v2937_v29 }
  0xfc   : > { %838 = vrot.lane.b32.xlu0 %v829_v0, %s2673_s18  ;;  %836 = vrot.lane.b32.xlu1 %v828_v6, %s2673_s18  ;;  %v1036_v0 = vmul.f32 %v3102_v8, %v2948_v35  ;;  %v1033_v6 = vmul.f32 %v3102_v8, %v2940_v30 }
  0xfe   : > { %v1045_v27 = vrot.slane %v1033_v6, 1  ;;  %v1143_v6 = vmul.f32 %v3114_v14, %v2940_v30 }
 0x100   : > { %842 = vrot.lane.b32.xlu0 %v831_v16, %s2673_s18  ;;  %840 = vrot.lane.b32.xlu1 %v830_v51, %s2673_s18  ;;  %v1002_v16 = vsel %vm480_vm0, %v1000_v60, %v1001_v9  ;;  %v1006_v51 = vrot.slane %v992_v10, 1 }
 0x102   : > { %v1007_v28 = vsel %vm480_vm0, %v1001_v9, %v1006_v51 }
 0x104   : > { %869 = vrot.lane.b32.xlu0 %v860_v19, %s2674_s10  ;;  %867 = vrot.lane.b32.xlu1 %v859_v20, %s2674_s10  ;;  %v1035_v19 = vmul.f32 %v3102_v8, %v2945_v34 }
 0x106   : > { %v1046_v31 = vrot.slane %v1035_v19, 1 }
 0x108   : > { %873 = vrot.lane.b32.xlu0 %v862_v21, %s2674_s10  ;;  %871 = vrot.lane.b32.xlu1 %v861_v22, %s2674_s10  ;;  %v1009_v22 = vsel %vm480_vm0, %v1004_v5, %v1008_v12  ;;  %v1047_v49 = vsel %vm480_vm0, %v1045_v27, %v1046_v31 }
 0x10c   : > { %901 = vrot.lane.b32.xlu0 %v892_v25, %s2675_s12  ;;  %899 = vrot.lane.b32.xlu1 %v891_v26, %s2675_s12  ;;  %v1048_v25 = vrot.slane %v1034_v13, 1  ;;  %v1049_v26 = vrot.slane %v1036_v0, 1  ;;  %v1146_v0 = vmul.f32 %v3114_v14, %v2948_v35 }
 0x10e   : > { %v1050_v48 = vsel %vm480_vm0, %v1048_v25, %v1049_v26  ;;  %v1054_v3 = vsel %vm480_vm0, %v1049_v26, %v1053_v41  ;;  %v1148_v25 = vmul.f32 %v3114_v14, %v2958_v40  ;;  %v1147_v26 = vmul.f32 %v3114_v14, %v2955_v39 }
 0x10f   : > { %v1188_v41 = vmul.f32 %v3116_v15, %v2940_v30 }
 0x110   : > { %905 = vrot.lane.b32.xlu0 %v894_v38, %s2675_s12  ;;  %903 = vrot.lane.b32.xlu1 %v893_v42, %s2675_s12  ;;  %v1037_v38 = vmul.f32 %v3102_v8, %v2955_v39  ;;  %v1079_v42 = vmul.f32 %v3104_v11, %v2937_v29  ;;  %v1080_v8 = vmul.f32 %v3104_v11, %v2945_v34  ;;  %v1163_v43 = vrot.slane %v1148_v25, 2 }
 0x111   : > { %v1161_v47 = vrot.slane %v1147_v26, 2  ;;  %v3325_v25 = vmul.f32 %v3051_v33, %v2958_v40  ;;  %v1236_v26 = vmul.f32 %v3124_v17, %v2948_v35 }
 0x112   : > { %v1051_v53 = vrot.slane %v1037_v38, 1  ;;  %v1093_v54 = vrot.slane %v1079_v42, 1  ;;  %v1091_v57 = vrot.slane %v1080_v8, 1  ;;  %v1189_v8 = vmul.f32 %v3116_v15, %v2937_v29 }
 0x114   : > { %967 = vrot.lane.b32.xlu0 %v960_v56, %s2672_s13  ;;  %965 = vrot.lane.b32.xlu1 %v957_v58, %s2672_s13  ;;  %v1052_v4 = vsel %vm480_vm0, %v1046_v31, %v1051_v53  ;;  %v1095_v9 = vsel %vm480_vm0, %v1093_v54, %v1094_v55  ;;  %v1092_v10 = vsel %vm480_vm0, %v1090_v61, %v1091_v57  ;;  %v1155_v31 = vrot.slane %v1143_v6, 2 }
 0x115   : > { %v1190_v53 = vmul.f32 %v3116_v15, %v2945_v34  ;;  %v3282_v54 = vmul.f32 %v3051_v33, %v2955_v39  ;;  %v3292_v61 = vmul.f32 %v2970_v46, %v2940_v30  ;;  %v1192_v6 = vmul.f32 %v3116_v15, %v2955_v39 }
 0x118   : > { %971 = vrot.lane.b32.xlu0 %v964_v63, %s2672_s13  ;;  %969 = vrot.lane.b32.xlu1 %v962_v2, %s2672_s13  ;;  %v1083_v63 = vmul.f32 %v3104_v11, %v2958_v40  ;;  %v1082_v2 = vmul.f32 %v3104_v11, %v2955_v39  ;;  %v1144_v11 = vmul.f32 %v3114_v14, %v2937_v29 }
 0x11a   : > { %v1098_v12 = vrot.slane %v1083_v63, 1  ;;  %v1096_v13 = vrot.slane %v1082_v2, 1  ;;  %v1158_v27 = vrot.slane %v1144_v11, 2  ;;  %v3300_v63 = vmul.f32 %v2970_v46, %v2945_v34 }
 0x11b   : > { %v1201_v11 = vrot.slane %v1190_v53, 2 }
 0x11c   : > { %1012 = vrot.lane.b32.xlu0 %v1005_v7, %s2673_s18  ;;  %1010 = vrot.lane.b32.xlu1 %v1002_v16, %s2673_s18  ;;  %v1145_v7 = vmul.f32 %v3114_v14, %v2945_v34  ;;  %v1099_v19 = vsel %vm480_vm0, %v1094_v55, %v1098_v12  ;;  %v1191_v14 = vmul.f32 %v3116_v15, %v2948_v35 }
 0x11d   : > { %v3288_v55 = vmul.f32 %v2970_v46, %v2937_v29 }
 0x11e   : > { %v3198_v20 = vpop.permute.xlu0 %384  ;;  %v3200_v21 = vpop.permute.xlu1 %382  ;;  %v1156_v32 = vrot.slane %v1145_v7, 2  ;;  %v1204_v12 = vrot.slane %v1191_v14, 2  ;;  %v3314_v7 = vmul.f32 %v2970_v46, %v2955_v39 }
 0x120   : > { %1016 = vrot.lane.b32.xlu0 %v1009_v22, %s2673_s18  ;;  %1014 = vrot.lane.b32.xlu1 %v1007_v28, %s2673_s18  ;;  %v1097_v22 = vsel %vm480_vm0, %v1091_v57, %v1096_v13  ;;  %v1159_v28 = vrot.slane %v1146_v0, 2  ;;  %v3296_v57 = vmul.f32 %v2970_v46, %v2948_v35  ;;  %v1200_v13 = vrot.slane %v1188_v41, 2 }
 0x121   : > { %v1193_v0 = vmul.f32 %v3116_v15, %v2958_v40  ;;  %v1234_v15 = vmul.f32 %v3124_v17, %v2937_v29  ;;  %v1206_v41 = vrot.slane %v1192_v6, 2 }
 0x122   : > { %v3214_v44 = vpop.permute.xlu0 %388  ;;  %v3216_v45 = vpop.permute.xlu1 %386 }
 0x123   : > { %v1207_v50 = vsel %vm640_vm1, %v1201_v11, %v1206_v41  ;;  %v4078_v41 = vrot.slane %v3325_v25, 1 }
 0x124   : > { %1057 = vrot.lane.b32.xlu0 %v1050_v48, %s2674_s10  ;;  %1055 = vrot.lane.b32.xlu1 %v1047_v49, %s2674_s10  ;;  %v1160_v48 = vsel %vm640_vm1, %v1158_v27, %v1159_v28  ;;  %v1157_v49 = vsel %vm640_vm1, %v1155_v31, %v1156_v32  ;;  %v1235_v27 = vmul.f32 %v3124_v17, %v2945_v34 }
 0x126   : > { %v3226_v56 = vpop.permute.xlu0 %390  ;;  %v3228_v58 = vpop.permute.xlu1 %392  ;;  %v1246_v6 = vrot.slane %v1235_v27, 2 }
 0x128   : > { %1061 = vrot.lane.b32.xlu0 %v1054_v3, %s2674_s10  ;;  %1059 = vrot.lane.b32.xlu1 %v1052_v4, %s2674_s10  ;;  %v1164_v4 = vsel %vm640_vm1, %v1159_v28, %v1163_v43  ;;  %v471_v43 = vmul.f32 %v3051_v33, %v2948_v35 }
 0x12a   : > { %v3238_v5 = vpop.permute.xlu0 %433  ;;  %v3240_v60 = vpop.permute.xlu1 %431 }
 0x12c   : > { %1102 = vrot.lane.b32.xlu0 %v1095_v9, %s2675_s12  ;;  %1100 = vrot.lane.b32.xlu1 %v1092_v10, %s2675_s12  ;;  %v1162_v9 = vsel %vm640_vm1, %v1156_v32, %v1161_v47  ;;  %v1203_v10 = vrot.slane %v1189_v8, 2  ;;  %v469_v32 = vmul.f32 %v3051_v33, %v2937_v29  ;;  %v1238_v47 = vmul.f32 %v3124_v17, %v2958_v40 }
 0x12d   : > { %v1237_v8 = vmul.f32 %v3124_v17, %v2955_v39 }
 0x12e   : > { %v3254_v16 = vpop.permute.xlu0 %437  ;;  %v3256_v51 = vpop.permute.xlu1 %435  ;;  %v1205_v14 = vsel %vm640_vm1, %v1203_v10, %v1204_v12  ;;  %v1248_v10 = vrot.slane %v1234_v15, 2  ;;  %v1253_v1 = vrot.slane %v1238_v47, 2  ;;  %v3376_v15 = vmul.f32 %v3079_v59, %v2958_v40 }
 0x12f   : > { %v1251_v62 = vrot.slane %v1237_v8, 2 }
 0x130   : > { %1106 = vrot.lane.b32.xlu0 %v1099_v19, %s2675_s12  ;;  %1104 = vrot.lane.b32.xlu1 %v1097_v22, %s2675_s12  ;;  %v3318_v19 = vmul.f32 %v2970_v46, %v2958_v40  ;;  %v1233_v46 = vmul.f32 %v3124_v17, %v2940_v30  ;;  %v470_v17 = vmul.f32 %v3051_v33, %v2945_v34 }
 0x132   : > { %v3266_v38 = vpop.permute.xlu0 %441  ;;  %v3268_v42 = vpop.permute.xlu1 %439 }
 0x134   : > { %1167 = vrot.lane.b32.xlu0 %v1160_v48, %s2672_s13  ;;  %1165 = vrot.lane.b32.xlu1 %v1157_v49, %s2672_s13  ;;  %v1202_v48 = vsel %vm640_vm1, %v1200_v13, %v1201_v11  ;;  %v1208_v49 = vrot.slane %v1193_v0, 2  ;;  %v1249_v13 = vrot.slane %v1236_v26, 2  ;;  %v1245_v0 = vrot.slane %v1233_v46, 2 }
 0x135   : > { %v482_v46 = vrot.slane %v470_v17, 1  ;;  %v1282_v26 = vmul.f32 %v3126_v18, %v2955_v39 }
 0x136   : > { %v3302_v2 = vpop.permute.xlu0 %542  ;;  %v3304_v3 = vpop.permute.xlu1 %805  ;;  %v1209_v52 = vsel %vm640_vm1, %v1204_v12, %v1208_v49  ;;  %v1250_v11 = vsel %vm640_vm1, %v1248_v10, %v1249_v13  ;;  %v1247_v27 = vsel %vm640_vm1, %v1245_v0, %v1246_v6  ;;  %v1254_v8 = vsel %vm640_vm1, %v1249_v13, %v1253_v1 }
 0x137   : > { %4072 = vst [vmem:[#allocation15_spill] sm:$0xff] %v3304_v3  ;;  %v1279_v3 = vmul.f32 %v3126_v18, %v2937_v29  ;;  %v1252_v49 = vsel %vm640_vm1, %v1246_v6, %v1251_v62  ;;  %v1283_v0 = vmul.f32 %v3126_v18, %v2958_v40  ;;  %v1345_v1 = vmul.f32 %v3134_v23, %v2937_v29 }
 0x138   : > { %1171 = vrot.lane.b32.xlu0 %v1164_v4, %s2672_s13  ;;  %1169 = vrot.lane.b32.xlu1 %v1162_v9, %s2672_s13  ;;  %v3354_v4 = vmul.f32 %v3079_v59, %v2955_v39  ;;  %v468_v9 = vmul.f32 %v3051_v33, %v2940_v30  ;;  %v3370_v33 = vmul.f32 %v3126_v18, %v2948_v35 }
 0x139   : > { %v1293_v17 = vrot.slane %v1279_v3, 2  ;;  %v1347_v3 = vmul.f32 %v3134_v23, %v2948_v35 }
 0x13a   : > { %v3335_v28 = vpop.permute.xlu0 %600  ;;  %v3337_v31 = vpop.permute.xlu1 %544  ;;  %v481_v12 = vrot.slane %v468_v9, 1  ;;  %v1294_v10 = vrot.slane %v3370_v33, 2  ;;  %v1344_v33 = vmul.f32 %v3134_v23, %v2940_v30 }
 0x13b   : > { %4073 = vst [vmem:[#allocation16_spill] sm:$0xff] %v3335_v28 }
 0x13c   : > { %1212 = vrot.lane.b32.xlu0 %v1205_v14, %s2673_s18  ;;  %1210 = vrot.lane.b32.xlu1 %v1202_v48, %s2673_s18  ;;  %v484_v14 = vrot.slane %v469_v32, 1  ;;  %v485_v48 = vrot.slane %v471_v43, 1  ;;  %v1278_v32 = vmul.f32 %v3126_v18, %v2940_v30  ;;  %v3408_v62 = vsel %vm480_vm0, %v481_v12, %v482_v46 }
 0x13e   : > { %v3360_v22 = vpop.permute.xlu0 %702  ;;  %v3362_v53 = vpop.permute.xlu1 %602  ;;  %v3390_v47 = vsel %vm480_vm0, %v484_v14, %v485_v48  ;;  %v3397_v9 = vsel %vm480_vm0, %v485_v48, %v4078_v41  ;;  %v1290_v13 = vrot.slane %v1278_v32, 2  ;;  %v4080_v48 = vrot.slane %v3282_v54, 1 }
 0x13f   : > { %4074 = vst [vmem:[#allocation17_spill] sm:$0xff] %v3360_v22  ;;  %4075 = vst [vmem:[#allocation18_spill] sm:$0xff] %v3362_v53  ;;  %v629_v32 = vmul.f32 %v3079_v59, %v2937_v29  ;;  %v1295_v41 = vsel %vm640_vm1, %v1293_v17, %v1294_v10  ;;  %v1296_v14 = vrot.slane %v1282_v26, 2  ;;  %v1360_v22 = vrot.slane %v1347_v3, 3  ;;  %v1731_v17 = vld [vmem:[%s4044_s3 + $0x78] sm:$0xff] }
 0x140   : > { %1216 = vrot.lane.b32.xlu0 %v1209_v52, %s2673_s18  ;;  %1214 = vrot.lane.b32.xlu1 %v1207_v50, %s2673_s18  ;;  %v1280_v52 = vmul.f32 %v3126_v18, %v2945_v34  ;;  %4079 = vst [vmem:[#allocation21_spill] sm:$0xff] %v3397_v9  ;;  %v3417_v18 = vsel %vm480_vm0, %v482_v46, %v4080_v48  ;;  %v1298_v48 = vrot.slane %v1283_v0, 2  ;;  %v1356_v0 = vrot.slane %v1344_v33, 3 }
 0x141   : > { %4081 = vst [vmem:[#allocation22_spill] sm:$0xff] %v3417_v18  ;;  %v1349_v46 = vmul.f32 %v3134_v23, %v2958_v40  ;;  %v630_v18 = vmul.f32 %v3079_v59, %v2945_v34  ;;  %2369 = vmatprep.subr.mxu0 %v1731_v17  ;;  %v644_v3 = vrot.slane %v629_v32, 2  ;;  %v1389_v53 = vmul.f32 %v3136_v24, %v2940_v30 }
 0x142   : > { %v3385_v50 = vpop.permute.xlu0 %762  ;;  %v3387_v43 = vpop.permute.xlu1 %704  ;;  %v1291_v6 = vrot.slane %v1280_v52, 2  ;;  %v631_v52 = vmul.f32 %v3079_v59, %v2948_v35  ;;  %2370 = vmatpush3.msra.mxu0 %v1731_v17  ;;  %v3461_v9 = vmul.f32 %v3136_v24, %v2945_v34 }
 0x143   : > { %4076 = vst [vmem:[#allocation19_spill] sm:$0xff] %v3385_v50  ;;  %4077 = vst [vmem:[#allocation20_spill] sm:$0xff] %v3387_v43  ;;  %v1348_v50 = vmul.f32 %v3134_v23, %v2955_v39  ;;  %v628_v43 = vmul.f32 %v3079_v59, %v2940_v30  ;;  %v1364_v28 = vrot.slane %v1349_v46, 3  ;;  %v642_v46 = vrot.slane %v630_v18, 2 }
 0x144   : > { %1257 = vrot.lane.b32.xlu0 %v1250_v11, %s2674_s10  ;;  %1255 = vrot.lane.b32.xlu1 %v1247_v27, %s2674_s10  ;;  %v1346_v27 = vmul.f32 %v3134_v23, %v2945_v34  ;;  %v1292_v26 = vsel %vm640_vm1, %v1290_v13, %v1291_v6  ;;  %v1390_v23 = vmul.f32 %v3136_v24, %v2937_v29 }
 0x145   : > { %v1299_v13 = vsel %vm640_vm1, %v1294_v10, %v1298_v48  ;;  %v1362_v33 = vrot.slane %v1348_v50, 3  ;;  %v1730_v50 = vld [vmem:[%s4044_s3 + $0x70] sm:$0xff]  ;;  %v1729_v10 = vld [vmem:[%s4044_s3 + $0x68] sm:$0xff] }
 0x146   : > { %v3421_v11 = vpop.permute.xlu0 %536  ;;  %v3423_v12 = vpop.permute.xlu1 %760  ;;  %v1357_v59 = vrot.slane %v1346_v27, 3  ;;  %v1297_v27 = vsel %vm640_vm1, %v1291_v6, %v1296_v14  ;;  %v1404_v48 = vrot.slane %v1390_v23, 3  ;;  %v1393_v14 = vmul.f32 %v3136_v24, %v2955_v39  ;;  %2371 = vmatprep.subr.mxu0 %v1730_v50 }
 0x147   : > { %4082 = vst [vmem:[#allocation23_spill] sm:$0xff] %v3421_v11  ;;  %4083 = vst [vmem:[#allocation24_spill] sm:$0xff] %v3423_v12  ;;  %v1359_v12 = vrot.slane %v1345_v1, 3  ;;  %v645_v11 = vrot.slane %v631_v52, 2  ;;  %v641_v52 = vrot.slane %v628_v43, 2  ;;  %v1435_v23 = vmul.f32 %v3148_v36, %v2937_v29  ;;  %2372 = vmatpush3.msra.mxu0 %v1730_v50 }
 0x148   : > { %1261 = vrot.lane.b32.xlu0 %v1254_v8, %s2674_s10  ;;  %1259 = vrot.lane.b32.xlu1 %v1252_v49, %s2674_s10  ;;  %v3450_v8 = vmul.f32 %v3136_v24, %v2948_v35  ;;  %v1358_v18 = vsel %vm1325_vm2, %v1356_v0, %v1357_v59  ;;  %v3528_v50 = vmul.f32 %v3148_v36, %v2940_v30 }
 0x149   : > { %v1361_v32 = vsel %vm1325_vm2, %v1359_v12, %v1360_v22  ;;  %v3484_v12 = vsel %vm640_vm1, %v644_v3, %v645_v11  ;;  %2373 = vmatprep.subr.mxu0 %v1729_v10 }
 0x14a   : > { %v3452_v49 = vpop.permute.xlu0 %540  ;;  %v3454_v1 = vpop.permute.xlu1 %534  ;;  %v1405_v17 = vrot.slane %v3450_v8, 3  ;;  %v1363_v8 = vsel %vm1325_vm2, %v1357_v59, %v1362_v33  ;;  %2374 = vmatpush3.msra.mxu0 %v1729_v10  ;;  %v397_v33 = vsel %vm394_vm3, %v3226_v56, %v3228_v58  ;;  %v1727_v10 = vld [vmem:[%s4044_s3 + $0x58] sm:$0xff]  ;;  %v396_v56 = vsel %vm394_vm3, %v3216_v45, %v3214_v44 }
 0x14b   : > { %4084 = vst [vmem:[#allocation25_spill] sm:$0xff] %v3454_v1 }
 0x14c   : > { %1302 = vrot.lane.b32.xlu0 %v1295_v41, %s2675_s12  ;;  %1300 = vrot.lane.b32.xlu1 %v1292_v26, %s2675_s12  ;;  %v1394_v41 = vmul.f32 %v3136_v24, %v2958_v40  ;;  %v1365_v26 = vsel %vm1325_vm2, %v1360_v22, %v1364_v28  ;;  %v4087_v24 = vrot.slane %v3376_v15, 2  ;;  %v3499_v22 = vsel %vm640_vm1, %v641_v52, %v642_v46 }
 0x14d   : > { %v4088_v28 = vrot.slane %v3354_v4, 2  ;;  %v3517_v59 = vsel %vm1325_vm2, %v1404_v48, %v1405_v17  ;;  %v409_v48 = vadd.f32 %v3228_v58, %v3318_v19  ;;  %v1726_v58 = vld [vmem:[%s4044_s3 + $0x50] sm:$0xff] }
 0x14e   : > { %v3478_v43 = vpop.permute.xlu0 %594  ;;  %v3480_v6 = vpop.permute.xlu1 %538  ;;  %v3493_v1 = vsel %vm640_vm1, %v645_v11, %v4087_v24  ;;  %v3508_v11 = vmul.f32 %v3148_v36, %v2948_v35  ;;  %v1409_v3 = vrot.slane %v1394_v41, 3  ;;  %v444_v41 = vsel %vm443_vm4, %v3240_v60, %v3238_v5 }
 0x14f   : > { %4085 = vst [vmem:[#allocation26_spill] sm:$0xff] %v3478_v43  ;;  %4086 = vst [vmem:[#allocation27_spill] sm:$0xff] %v3480_v6  ;;  %v1401_v43 = vrot.slane %v1389_v53, 3  ;;  %v1402_v6 = vrot.slane %v3461_v9, 3  ;;  %v3504_v0 = vsel %vm640_vm1, %v642_v46, %v4088_v28  ;;  %v1728_v53 = vld [vmem:[%s4044_s3 + $0x60] sm:$0xff]  ;;  %v395_v9 = vsel %vm394_vm3, %v3200_v21, %v3198_v20 }
 0x150   : > { %1306 = vrot.lane.b32.xlu0 %v1299_v13, %s2675_s12  ;;  %1304 = vrot.lane.b32.xlu1 %v1297_v27, %s2675_s12  ;;  %v1407_v13 = vrot.slane %v1393_v14, 3  ;;  %v1449_v46 = vrot.slane %v1435_v23, 3  ;;  %v3532_v21 = vmul.f32 %v3148_v36, %v2945_v34  ;;  %v405_v34 = vadd.f32 %v3198_v20, %v3288_v55 }
 0x151   : > { %2375 = vmatprep.subr.mxu0 %v1728_v53  ;;  %v1403_v14 = vsel %vm1325_vm2, %v1401_v43, %v1402_v6  ;;  %v404_v23 = vadd.f32 %v395_v9, %v3292_v61  ;;  %v446_v24 = vsel %vm443_vm4, %v3268_v42, %v3266_v38  ;;  %v1450_v45 = vrot.slane %v3508_v11, 3 }
 0x152   : > { %v3522_v27 = vpop.permute.xlu0 %598  ;;  %v3524_v52 = vpop.permute.xlu1 %592  ;;  %2376 = vmatpush3.msra.mxu0 %v1728_v53  ;;  %v407_v60 = vadd.f32 %v3214_v44, %v3296_v57  ;;  %v408_v20 = vadd.f32 %v397_v33, %v3314_v7  ;;  %v445_v55 = vsel %vm443_vm4, %v3256_v51, %v3254_v16  ;;  %v458_v42 = vadd.f32 %v3266_v38, %v409_v48  ;;  %v1725_v38 = vld [vmem:[%s4044_s3 + $0x48] sm:$0xff]  ;;  %v4096_v48 = vld [vmem:[#allocation25_spill] sm:$0xff] }
 0x153   : > { %2377 = vmatprep.subr.mxu0 %v1727_v10  ;;  %v406_v61 = vadd.f32 %v396_v56, %v3300_v63  ;;  %v454_v19 = vadd.f32 %v3238_v5, %v405_v34  ;;  %v1410_v28 = vsel %vm1325_vm2, %v1405_v17, %v1409_v3  ;;  %v1408_v7 = vsel %vm1325_vm2, %v1402_v6, %v1407_v13  ;;  %v4095_v56 = vld [vmem:[#allocation23_spill] sm:$0xff]  ;;  %v4097_v34 = vld [vmem:[#allocation22_spill] sm:$0xff] }
 0x154   : > { %1368 = vrot.lane.b32.xlu0 %v1361_v32, %s2672_s13  ;;  %1366 = vrot.lane.b32.xlu1 %v1358_v18, %s2672_s13  ;;  %v453_v32 = vadd.f32 %v444_v41, %v404_v23  ;;  %v456_v44 = vadd.f32 %v3254_v16, %v407_v60  ;;  %v457_v57 = vadd.f32 %v446_v24, %v408_v20  ;;  %v1446_v51 = vrot.slane %v3528_v50, 3  ;;  %v1723_v23 = vld [vmem:[%s4044_s3 + $0x38] sm:$0xff] }
 0x155   : > { %2378 = vmatpush3.msra.mxu0 %v1727_v10  ;;  %v455_v5 = vadd.f32 %v445_v55, %v406_v61  ;;  %v3581_v63 = vsel %vm1325_vm2, %v1449_v46, %v1450_v45  ;;  %v1447_v16 = vrot.slane %v3532_v21, 3  ;;  %v1439_v17 = vmul.f32 %v3148_v36, %v2958_v40  ;;  %v4093_v21 = vld [vmem:[#allocation18_spill] sm:$0xff] }
 0x156   : > { %v3567_v43 = vpop.permute.xlu0 %696  ;;  %v597_v18 = vpop.permute.xlu1 %596  ;;  %2379 = vmatprep.subr.mxu0 %v1726_v58  ;;  %v4089_v6 = vrot.slane %v3325_v25, 1  ;;  %v1438_v9 = vmul.f32 %v3148_v36, %v2955_v39  ;;  %v548_v3 = vsel %vm394_vm3, %v3302_v2, %v3337_v31  ;;  %v498_v40 = vadd.f32 %v3390_v47, %v454_v19  ;;  %v4091_v47 = vld [vmem:[#allocation21_spill] sm:$0xff] }
 0x157   : > { %2380 = vmatpush3.msra.mxu0 %v1726_v58  ;;  %v497_v25 = vadd.f32 %v3408_v62, %v453_v32  ;;  %v4090_v36 = vrot.slane %v3282_v54, 1  ;;  %v500_v46 = vadd.f32 %v4091_v47, %v456_v44  ;;  %v4092_v62 = vld [vmem:[#allocation27_spill] sm:$0xff]  ;;  %v546_v41 = vsel %vm394_vm3, %v4096_v48, %v4095_v56 }
 0x158   : > { %1372 = vrot.lane.b32.xlu0 %v1365_v26, %s2672_s13  ;;  %1370 = vrot.lane.b32.xlu1 %v1363_v8, %s2672_s13  ;;  %v502_v53 = vadd.f32 %v4089_v6, %v458_v42  ;;  %v3592_v26 = vmul.f32 %v3150_v37, %v2937_v29  ;;  %v3596_v8 = vmul.f32 %v3150_v37, %v2948_v35  ;;  %v1724_v35 = vld [vmem:[%s4044_s3 + $0x40] sm:$0xff]  ;;  %v1452_v32 = vrot.slane %v1438_v9, 3 }
 0x159   : > { %v3607_v29 = vmul.f32 %v3150_v37, %v2940_v30  ;;  %2381 = vmatprep.subr.mxu0 %v1725_v38  ;;  %v501_v33 = vadd.f32 %v4090_v36, %v457_v57  ;;  %v547_v50 = vsel %vm394_vm3, %v4092_v62, %v3452_v49  ;;  %v4094_v30 = vld [vmem:[#allocation16_spill] sm:$0xff]  ;;  %v499_v54 = vadd.f32 %v4097_v34, %v455_v5 }
 0x15a   : > { %v3603_v13 = vpop.permute.xlu0 %700  ;;  %v695_v39 = vpop.permute.xlu1 %694  ;;  %v560_v2 = vadd.f32 %v3337_v31, %v502_v53  ;;  %2382 = vmatpush3.msra.mxu0 %v1725_v38  ;;  %v606_v10 = vsel %vm443_vm4, %v4094_v30, %v4093_v21  ;;  %v1454_v31 = vrot.slane %v1439_v17, 3  ;;  %v558_v60 = vadd.f32 %v3452_v49, %v500_v46  ;;  %v3665_v36 = vld [vmem:[%s2934_s25 + $0x28] sm:$0xf] }
 0x15b   : > { %v559_v24 = vadd.f32 %v548_v3, %v501_v33  ;;  %v605_v20 = vsel %vm443_vm4, %v597_v18, %v3522_v27  ;;  %2383 = vmatprep.subr.mxu0 %v1724_v35  ;;  %v556_v55 = vadd.f32 %v4095_v56, %v498_v40  ;;  %v557_v42 = vadd.f32 %v547_v50, %v499_v54  ;;  %v1722_v18 = vld [vmem:[%s4044_s3 + $0x30] sm:$0xff]  ;;  %v4104_v56 = vld [vmem:[#allocation24_spill] sm:$0xff] }
 0x15c   : > { %1413 = vrot.lane.b32.xlu0 %v3517_v59, %s2673_s18  ;;  %1411 = vrot.lane.b32.xlu1 %v1403_v14, %s2673_s18  ;;  %v618_v58 = vadd.f32 %v4093_v21, %v560_v2  ;;  %v4098_v59 = vld [vmem:[#allocation26_spill] sm:$0xff]  ;;  %v555_v57 = vadd.f32 %v546_v41, %v497_v25  ;;  %v616_v49 = vadd.f32 %v3522_v27, %v558_v60  ;;  %v1494_v9 = vrot.slane %v3592_v26, 3  ;;  %v1721_v26 = vld [vmem:[%s4044_s3 + $0x28] sm:$0xff] }
 0x15d   : > { %v604_v14 = vsel %vm443_vm4, %v3524_v52, %v4098_v59  ;;  %2384 = vmatpush3.msra.mxu0 %v1724_v35  ;;  %v617_v44 = vadd.f32 %v606_v10, %v559_v24  ;;  %v1448_v38 = vsel %vm1325_vm2, %v1446_v51, %v1447_v16  ;;  %v614_v5 = vadd.f32 %v4098_v59, %v556_v55  ;;  %v3649_v52 = vld [vmem:[%s2934_s25 + $0x10] sm:$0xff]  ;;  %v4101_v2 = vld [vmem:[#allocation20_spill] sm:$0xff]  ;;  %v4103_v10 = vld [vmem:[#allocation19_spill] sm:$0xff] }
 0x15e   : > { %v753_v61 = vpop.permute.xlu0 %752  ;;  %v699_v19 = vpop.permute.xlu1 %698  ;;  %2385 = vmatprep.subr.mxu0 %v1723_v23  ;;  %v615_v17 = vadd.f32 %v605_v20, %v557_v42  ;;  %v3653_v27 = vmul.f32 %v3649_v52, %v3150_v37  ;;  %v4099_v51 = vrot.slane %v3376_v15, 2  ;;  %v613_v53 = vadd.f32 %v604_v14, %v555_v57  ;;  %v3714_v20 = vld [vmem:[%s2934_s25] sm:$0xff] }
 0x15f   : > { %v1495_v3 = vrot.slane %v3596_v8, 3  ;;  %2386 = vmatpush3.msra.mxu0 %v1723_v23  ;;  %v1491_v35 = vrot.slane %v3607_v29, 3  ;;  %v3669_v15 = vmul.f32 %v3665_v36, %v3150_v37  ;;  %v4100_v33 = vrot.slane %v3354_v4, 2 }
 0x160   : > { %1417 = vrot.lane.b32.xlu0 %v1410_v28, %s2673_s18  ;;  %1415 = vrot.lane.b32.xlu1 %v1408_v7, %s2673_s18  ;;  %v662_v6 = vadd.f32 %v4099_v51, %v618_v58  ;;  %v1455_v28 = vsel %vm1325_vm2, %v1450_v45, %v1454_v31  ;;  %v1453_v7 = vsel %vm1325_vm2, %v1447_v16, %v1452_v32  ;;  %v4102_v45 = vld [vmem:[#allocation17_spill] sm:$0xff]  ;;  %v1492_v4 = vrot.slane %v3653_v27, 3 }
 0x161   : > { %2387 = vmatprep.subr.mxu0 %v1722_v18  ;;  %v661_v11 = vadd.f32 %v4100_v33, %v617_v44  ;;  %v708_v16 = vsel %vm394_vm3, %v4102_v45, %v4101_v2  ;;  %v660_v29 = vadd.f32 %v3493_v1, %v616_v49  ;;  %v707_v47 = vsel %vm394_vm3, %v699_v19, %v3603_v13  ;;  %v1720_v1 = vld [vmem:[%s4044_s3 + $0x20] sm:$0xff] }
 0x162   : > { %v757_v40 = vpop.permute.xlu0 %756  ;;  %v755_v25 = vpop.permute.xlu1 %754  ;;  %2388 = vmatpush3.msra.mxu0 %v1722_v18  ;;  %v658_v46 = vadd.f32 %v3484_v12, %v614_v5  ;;  %v706_v62 = vsel %vm394_vm3, %v695_v39, %v3567_v43  ;;  %v659_v50 = vadd.f32 %v3504_v0, %v615_v17  ;;  %v720_v21 = vadd.f32 %v4101_v2, %v662_v6  ;;  %v2290_v0 = vld [vmem:[%s4043_s2] ss:$0 sm:$0xff]  ;;  %v1718_v18 = vld [vmem:[%s4044_s3 + $0x10] sm:$0xff] }
 0x163   : > { %v718_v12 = vadd.f32 %v3603_v13, %v660_v29  ;;  %v657_v30 = vadd.f32 %v3499_v22, %v613_v53  ;;  %v3700_v39 = vld [vmem:[%s2934_s25 + $0x20] sm:$0xf]  ;;  %2389 = vmatprep.subr.mxu0 %v1721_v26  ;;  %v766_v48 = vsel %vm443_vm4, %v4104_v56, %v4103_v10  ;;  %v764_v22 = vsel %vm443_vm4, %v753_v61, %v755_v25 }
 0x164   : > { %1458 = vrot.lane.b32.xlu0 %v3581_v63, %s2674_s10  ;;  %1456 = vrot.lane.b32.xlu1 %v1448_v38, %s2674_s10  ;;  %v1483_v63 = vmul.f32 %v3700_v39, %v3150_v37  ;;  %v716_v41 = vadd.f32 %v3567_v43, %v658_v46  ;;  %v717_v13 = vadd.f32 %v707_v47, %v659_v50  ;;  %v1719_v37 = vld [vmem:[%s4044_s3 + $0x18] sm:$0xff]  ;;  %v1499_v61 = vrot.slane %v3669_v15, 3  ;;  %v4105_v5 = vld [vmem:[#allocation15_spill] sm:$0xff] }
 0x165   : > { %2390 = vmatpush3.msra.mxu0 %v1721_v26  ;;  %v719_v31 = vadd.f32 %v708_v16, %v661_v11  ;;  %v715_v23 = vadd.f32 %v706_v62, %v657_v30  ;;  %v784_v43 = vmul.f32 %v3714_v20, %v2290_v0  ;;  %v778_v42 = vadd.f32 %v4103_v10, %v720_v21  ;;  %v1717_v26 = vld [vmem:[%s4044_s3 + $0x8] sm:$0xff] }
 0x166   : > { %v808_v34 = vpop.permute.xlu0 %807  ;;  %v759_v54 = vpop.permute.xlu1 %758  ;;  %2391 = vmatprep.subr.mxu0 %v1720_v1  ;;  %v774_v60 = vadd.f32 %v755_v25, %v716_v41  ;;  %v785_v44 = vmul.f32 %v3649_v52, %v2290_v0  ;;  %v1496_v49 = vsel %vm1325_vm2, %v1494_v9, %v1495_v3  ;;  %v1497_v38 = vrot.slane %v1483_v63, 3  ;;  %v3737_v9 = vld [vmem:[%s2934_s25 + $0x8] sm:$0xff]  ;;  %v4106_v25 = vld [vmem:[#allocation11_spill] sm:$0xff] }
 0x167   : > { %v765_v24 = vsel %vm443_vm4, %v757_v40, %v759_v54  ;;  %v776_v58 = vadd.f32 %v759_v54, %v718_v12  ;;  %v777_v59 = vadd.f32 %v766_v48, %v719_v31  ;;  %v773_v14 = vadd.f32 %v764_v22, %v715_v23  ;;  %2392 = vmatpush3.msra.mxu0 %v1720_v1  ;;  %v1716_v12 = vld [vmem:[%s4044_s3] sm:$0xff] }
 0x168   : > { %v775_v55 = vadd.f32 %v765_v24, %v717_v13  ;;  %1462 = vrot.lane.b32.xlu0 %v1455_v28, %s2674_s10  ;;  %1460 = vrot.lane.b32.xlu1 %v1453_v7, %s2674_s10  ;;  %v813_v17 = vsel %vm394_vm3, %v4105_v5, %v808_v34  ;;  %v1493_v53 = vsel %vm1325_vm2, %v1491_v35, %v1492_v4  ;;  %v1746_v40 = vrot.slane %v774_v60, 1  ;;  %v3742_v7 = vld [vmem:[%s2934_s25 + $0x18] sm:$0xff]  ;;  %v4107_v24 = vld [vmem:[#allocation12_spill] sm:$0xff]  ;;  %s328_s25 = scalar_lea.vmem [#allocation7], %s2279_s26 }
 0x169   : > { %v1747_v19 = vrot.slane %v776_v58, 1  ;;  %2393 = vmatprep.subr.mxu0 %v1719_v37  ;;  %v1546_v28 = vmul.f32 %v3737_v9, %v4106_v25  ;;  %v3746_v15 = vmul.f32 %v3742_v7, %v4106_v25  ;;  %v1545_v35 = vmul.f32 %v3714_v20, %v4106_v25  ;;  %v3774_v13 = vld [vmem:[#allocation2 + $0x78] sm:$0xff]  ;;  %s2187_s20 = sshll.u32 %s328_s25, 4  ;;  %s3993_s20 = int_to_ptr.vmem [resolvable:$true] %s2187_s20 }
 0x16a   : > { %v812_v32 = vpop.permute.xlu0 %811  ;;  %v810_v57 = vpop.permute.xlu1 %809  ;;  %v1744_v51 = vrot.slane %v775_v55, 1  ;;  %2394 = vmatpush3.msra.mxu0 %v1719_v37  ;;  %v1751_v33 = vrot.slane %v778_v42, 1  ;;  %v1749_v11 = vrot.slane %v777_v59, 1  ;;  %v1743_v2 = vrot.slane %v773_v14, 1  ;;  %p2599_p11 = scmp.lt.s32.totalorder %s3993_s20, %s2597_s21 }
 0x16b   : > { %v814_v6 = vsel %vm394_vm3, %v810_v57, %v812_v32  ;;  %v1500_v45 = vsel %vm1325_vm2, %v1495_v3, %v1499_v61  ;;  %2395 = vmatprep.subr.mxu0 %v1718_v18  ;;  %v817_v16 = vadd.f32 %v813_v17, %v784_v43  ;;  %v1748_v29 = vsel %vm480_vm0, %v1746_v40, %v1747_v19  ;;  %v2295_v57 = vld [vmem:[%s4043_s2 + $0x5] ss:$0 sm:$0xff] }
 0x16c   : > { %1503 = vrot.lane.b32.xlu0 %v1496_v49, %s2675_s12  ;;  %1501 = vrot.lane.b32.xlu1 %v1493_v53, %s2675_s12  ;;  %v1498_v62 = vsel %vm1325_vm2, %v1492_v4, %v1497_v38  ;;  %v1547_v50 = vmul.f32 %v3649_v52, %v4106_v25  ;;  %v1745_v1 = vsel %vm480_vm0, %v1743_v2, %v1744_v51  ;;  %v1560_v4 = vrot.slane %v1546_v28, 4  ;;  %v4108_v2 = vld [vmem:[#allocation13_spill] sm:$0xff] }
 0x16d   : > { %2396 = vmatpush3.msra.mxu0 %v1718_v18  ;;  %v1750_v8 = vsel %vm480_vm0, %v1744_v51, %v1749_v11  ;;  %v1752_v3 = vsel %vm480_vm0, %v1747_v19, %v1751_v33  ;;  %v1550_v30 = vmul.f32 %v3665_v36, %v4106_v25  ;;  %v818_v0 = vadd.f32 %v814_v6, %v785_v44 }
 0x16e   : > { %v839_v47 = vpop.permute.xlu0 %838  ;;  %v837_v46 = vpop.permute.xlu1 %836  ;;  %2397 = vmatprep.subr.mxu0 %v1717_v26  ;;  %v2529_v56 = vpack.i.bf16 %v1752_v3, %v1750_v8  ;;  %v2524_v48 = vpack.i.bf16 %v1748_v29, %v1745_v1  ;;  %v1561_v41 = vrot.slane %v3746_v15, 4  ;;  %v1557_v34 = vrot.slane %v1545_v35, 4 }
 0x16f   : > { %v844_v21 = vsel %vm443_vm4, %v837_v46, %v839_v47  ;;  %2398 = vmatpush3.msra.mxu0 %v1717_v26  ;;  %v1558_v54 = vrot.slane %v1547_v50, 4  ;;  %v1549_v31 = vmul.f32 %v3700_v39, %v4106_v25  ;;  %v1591_v58 = vmul.f32 %v3737_v9, %v4107_v24 }
 0x170   : > { %v848_v27 = vadd.f32 %v844_v21, %v817_v16  ;;  %1507 = vrot.lane.b32.xlu0 %v1500_v45, %s2675_s12  ;;  %1505 = vrot.lane.b32.xlu1 %v1498_v62, %s2675_s12  ;;  %v1593_v37 = vmul.f32 %v3742_v7, %v4107_v24  ;;  %v1565_v55 = vrot.slane %v1550_v30, 4  ;;  %v1590_v42 = vmul.f32 %v3714_v20, %v4107_v24 }
 0x171   : > { %2399 = vmatprep.subr.mxu0 %v1716_v12  ;;  %v1592_v59 = vmul.f32 %v3649_v52, %v4107_v24  ;;  %v1562_v61 = vsel %vm1526_vm6, %v1560_v4, %v1561_v41  ;;  %v1559_v19 = vsel %vm1526_vm6, %v1557_v34, %v1558_v54  ;;  %v1563_v32 = vrot.slane %v1549_v31, 4 }
 0x172   : > { %v843_v63 = vpop.permute.xlu0 %842  ;;  %v841_v10 = vpop.permute.xlu1 %840  ;;  %2400 = vmatpush3.msra.mxu0 %v1716_v12  ;;  %v1605_v49 = vrot.slane %v1591_v58, 4  ;;  %v1606_v38 = vrot.slane %v1593_v37, 4  ;;  %v1595_v18 = vmul.f32 %v3665_v36, %v4107_v24  ;;  %v1566_v51 = vsel %vm1526_vm6, %v1561_v41, %v1565_v55 }
 0x173   : > { %v845_v22 = vsel %vm443_vm4, %v841_v10, %v843_v63  ;;  %2404 = vmatprep.subr.mxu0 %v3774_v13  ;;  %v1602_v6 = vrot.slane %v1590_v42, 4  ;;  %v1603_v53 = vrot.slane %v1592_v59, 4  ;;  %v1594_v40 = vmul.f32 %v3700_v39, %v4107_v24 }
 0x174   : > { %v849_v23 = vadd.f32 %v845_v22, %v818_v0  ;;  %2530 = vrot.lane.b32.xlu0 %v2529_v56, %s2672_s13  ;;  %2525 = vrot.lane.b32.xlu1 %v2524_v48, %s2672_s13  ;;  %v1564_v28 = vsel %vm1526_vm6, %v1558_v54, %v1563_v32  ;;  %v919_v15 = vmul.f32 %v3714_v20, %v2295_v57  ;;  %v1610_v11 = vrot.slane %v1595_v18, 4 }
 0x175   : > { %v920_v35 = vmul.f32 %v3649_v52, %v2295_v57  ;;  %v1607_v33 = vsel %vm1526_vm6, %v1605_v49, %v1606_v38  ;;  %v1636_v45 = vmul.f32 %v3737_v9, %v4108_v2  ;;  %v1638_v16 = vmul.f32 %v3742_v7, %v4108_v2 }
 0x176   : > { %v870_v60 = vpop.permute.xlu0 %869  ;;  %v868_v43 = vpop.permute.xlu1 %867  ;;  %v1604_v46 = vsel %vm1526_vm6, %v1602_v6, %v1603_v53  ;;  %v1608_v62 = vrot.slane %v1594_v40, 4  ;;  %v1635_v50 = vmul.f32 %v3714_v20, %v4108_v2  ;;  %v1637_v1 = vmul.f32 %v3649_v52, %v4108_v2 }
 0x177   : > { %v876_v14 = vsel %vm875_vm5, %v868_v43, %v870_v60  ;;  %v925_v3 = vrot.slane %v919_v15, 1  ;;  %v926_v21 = vrot.slane %v920_v35, 1  ;;  %v921_v12 = vmul.f32 %v3700_v39, %v2295_v57  ;;  %v4109_v60 = vld [vmem:[#allocation14_spill] sm:$0xff] }
 0x178   : > { %v880_v44 = vadd.f32 %v876_v14, %v848_v27  ;;  %1569 = vrot.lane.b32.xlu0 %v1562_v61, %s2672_s13  ;;  %1567 = vrot.lane.b32.xlu1 %v1559_v19, %s2672_s13  ;;  %v1650_v4 = vrot.slane %v1636_v45, 4  ;;  %v1651_v30 = vrot.slane %v1638_v16, 4  ;;  %v1640_v0 = vmul.f32 %v3665_v36, %v4108_v2 }
 0x179   : > { %v1611_v56 = vsel %vm1526_vm6, %v1606_v38, %v1610_v11  ;;  %v1647_v48 = vrot.slane %v1635_v50, 4  ;;  %v1648_v41 = vrot.slane %v1637_v1, 4  ;;  %v1639_v22 = vmul.f32 %v3700_v39, %v4108_v2 }
 0x17a   : > { %v874_v5 = vpop.permute.xlu0 %873  ;;  %v872_v17 = vpop.permute.xlu1 %871  ;;  %v1609_v54 = vsel %vm1526_vm6, %v1603_v53, %v1608_v62  ;;  %v927_v31 = vsel %vm480_vm0, %v925_v3, %v926_v21  ;;  %v1652_v58 = vsel %vm1526_vm6, %v1650_v4, %v1651_v30  ;;  %v1655_v37 = vrot.slane %v1640_v0, 4  ;;  %v2300_v4 = vld [vmem:[%s4043_s2 + $0xa] ss:$0 sm:$0xff] }
 0x17b   : > { %v877_v25 = vsel %vm875_vm5, %v872_v17, %v874_v5  ;;  %v1681_v43 = vmul.f32 %v3737_v9, %v4109_v60  ;;  %v1653_v14 = vrot.slane %v1639_v22, 4  ;;  %v1683_v61 = vmul.f32 %v3742_v7, %v4109_v60 }
 0x17c   : > { %v881_v26 = vadd.f32 %v877_v25, %v849_v23  ;;  %1573 = vrot.lane.b32.xlu0 %v1566_v51, %s2672_s13  ;;  %1571 = vrot.lane.b32.xlu1 %v1564_v28, %s2672_s13  ;;  %v928_v23 = vrot.slane %v921_v12, 1  ;;  %v1680_v19 = vmul.f32 %v3714_v20, %v4109_v60  ;;  %v1682_v49 = vmul.f32 %v3649_v52, %v4109_v60 }
 0x17d   : > { %v1656_v38 = vsel %vm1526_vm6, %v1651_v30, %v1655_v37  ;;  %v1695_v7 = vrot.slane %v1681_v43, 4  ;;  %v1654_v51 = vsel %vm1526_vm6, %v1648_v41, %v1653_v14  ;;  %v1696_v6 = vrot.slane %v1683_v61, 4 }
 0x17e   : > { %v902_v29 = vpop.permute.xlu0 %901  ;;  %v900_v47 = vpop.permute.xlu1 %899  ;;  %v929_v57 = vsel %vm480_vm0, %v926_v21, %v928_v23  ;;  %v1692_v53 = vrot.slane %v1680_v19, 4  ;;  %v1693_v25 = vrot.slane %v1682_v49, 4  ;;  %v1685_v28 = vmul.f32 %v3665_v36, %v4109_v60 }
 0x17f   : > { %v908_v8 = vsel %vm907_vm7, %v900_v47, %v902_v29  ;;  %v1684_v15 = vmul.f32 %v3700_v39, %v4109_v60  ;;  %v1697_v11 = vsel %vm1526_vm6, %v1695_v7, %v1696_v6  ;;  %v1121_v23 = vmul.f32 %v3700_v39, %v2300_v4 }
 0x180   : > { %v912_v27 = vadd.f32 %v908_v8, %v880_v44  ;;  %1614 = vrot.lane.b32.xlu0 %v1607_v33, %s2673_s18  ;;  %1612 = vrot.lane.b32.xlu1 %v1604_v46, %s2673_s18  ;;  %v1649_v44 = vsel %vm1526_vm6, %v1647_v48, %v1648_v41  ;;  %v1694_v45 = vsel %vm1526_vm6, %v1692_v53, %v1693_v25  ;;  %v1700_v16 = vrot.slane %v1685_v28, 4 }
 0x181   : > { %v1698_v29 = vrot.slane %v1684_v15, 4 }
 0x182   : > { %v906_v63 = vpop.permute.xlu0 %905  ;;  %v904_v10 = vpop.permute.xlu1 %903  ;;  %v932_v42 = vadd.f32 %v927_v31, %v912_v27  ;;  %v1701_v50 = vsel %vm1526_vm6, %v1696_v6, %v1700_v16 }
 0x183   : > { %v909_v34 = vsel %vm907_vm7, %v904_v10, %v906_v63  ;;  %v1699_v1 = vsel %vm1526_vm6, %v1693_v25, %v1698_v29  ;;  %v1119_v10 = vmul.f32 %v3714_v20, %v2300_v4 }
 0x184   : > { %v913_v24 = vadd.f32 %v909_v34, %v881_v26  ;;  %1618 = vrot.lane.b32.xlu0 %v1611_v56, %s2673_s18  ;;  %1616 = vrot.lane.b32.xlu1 %v1609_v54, %s2673_s18  ;;  %v1120_v56 = vmul.f32 %v3649_v52, %v2300_v4  ;;  %s3998_s18 = scalar_lea.hbm %s4049_s8, %s2326_s17 }
 0x185   : > { %v1125_v54 = vrot.slane %v1119_v10, 2 }
 0x186   : > { %v968_v55 = vpop.permute.xlu0 %967  ;;  %v966_v59 = vpop.permute.xlu1 %965  ;;  %v933_v5 = vadd.f32 %v929_v57, %v913_v24  ;;  %v1126_v31 = vrot.slane %v1120_v56, 2 }
 0x187   : > { %v973_v32 = vsel %vm394_vm3, %v966_v59, %v968_v55  ;;  %v1128_v55 = vrot.slane %v1121_v23, 2 }
 0x188   : > { %v977_v9 = vadd.f32 %v973_v32, %v932_v42  ;;  %1659 = vrot.lane.b32.xlu0 %v1652_v58, %s2674_s10  ;;  %1657 = vrot.lane.b32.xlu1 %v1649_v44, %s2674_s10  ;;  %v1127_v43 = vsel %vm640_vm1, %v1125_v54, %v1126_v31 }
 0x189   : > { %v1129_v32 = vsel %vm640_vm1, %v1126_v31, %v1128_v55 }
 0x18a   : > { %v972_v18 = vpop.permute.xlu0 %971  ;;  %v970_v17 = vpop.permute.xlu1 %969 }
 0x18b   : > { %v974_v40 = vsel %vm394_vm3, %v970_v17, %v972_v18 }
 0x18c   : > { %v978_v35 = vadd.f32 %v974_v40, %v933_v5  ;;  %1663 = vrot.lane.b32.xlu0 %v1656_v38, %s2674_s10  ;;  %1661 = vrot.lane.b32.xlu1 %v1654_v51, %s2674_s10  ;;  %s4000_s10 = scalar_lea.sflag [#allocation4], %s326_s19 }
 0x18e   : > { %v1013_v26 = vpop.permute.xlu0 %1012  ;;  %v1011_v33 = vpop.permute.xlu1 %1010 }
 0x18f   : > { %v1018_v2 = vsel %vm443_vm4, %v1011_v33, %v1013_v26 }
 0x190   : > { %v1022_v47 = vadd.f32 %v1018_v2, %v977_v9  ;;  %1704 = vrot.lane.b32.xlu0 %v1697_v11, %s2675_s12  ;;  %1702 = vrot.lane.b32.xlu1 %v1694_v45, %s2675_s12 }
 0x192   : > { %v1017_v36 = vpop.permute.xlu0 %1016  ;;  %v1015_v46 = vpop.permute.xlu1 %1014 }
 0x193   : > { %v1019_v62 = vsel %vm443_vm4, %v1015_v46, %v1017_v36 }
 0x194   : > { %v1023_v8 = vadd.f32 %v1019_v62, %v978_v35  ;;  %1708 = vrot.lane.b32.xlu0 %v1701_v50, %s2675_s12  ;;  %1706 = vrot.lane.b32.xlu1 %v1699_v1, %s2675_s12  ;;  %s2592_s12 = scalar_lea.vmem %s3993_s20, 1024 }
 0x195   : > { %p2593_p12 = scmp.ne.s32.totalorder %s3993_s20, %s2592_s12  ;;  %p2600_p0 = scmp.lt.s32.totalorder %s2598_s23, %s2592_s12 }
 0x196   : > { %v1058_v3 = vpop.permute.xlu0 %1057  ;;  %v1056_v21 = vpop.permute.xlu1 %1055 }
 0x197   : > { %v1063_v12 = vsel %vm875_vm5, %v1056_v21, %v1058_v3  ;;  %v2305_v21 = vld [vmem:[%s4043_s2 + $0xf] ss:$0 sm:$0xff]  ;;  %p2594_p7 = pnand %p2593_p12, %p2762_p5  ;;  %p2601_p1 = por %p2600_p0, %p2599_p11 }
 0x198   : > { %v1067_v27 = vadd.f32 %v1063_v12, %v1022_v47  ;;  %v1319_v4 = vmul.f32 %v3714_v20, %v2305_v21 }
 0x199   : > { %p2595_p8 = pneg %p2594_p7 }
 0x19a   : > { %v1062_v30 = vpop.permute.xlu0 %1061  ;;  %v1060_v0 = vpop.permute.xlu1 %1059  ;;  %v1326_v31 = vrot.slane %v1319_v4, 3  ;;  %v1852_v4 = vld [vmem:[#allocation2 + $0x50] sm:$0xff] }
 0x19b   : > { %v1064_v63 = vsel %vm875_vm5, %v1060_v0, %v1062_v30  ;;  %v1320_v30 = vmul.f32 %v3649_v52, %v2305_v21  ;;  %p2602_p3 = pnand %p2601_p1, %p2595_p8 }
 0x19c   : > { %v1068_v48 = vadd.f32 %v1064_v63, %v1023_v8 }
 0x19d   : > { %v1327_v23 = vrot.slane %v1320_v30, 3 }
 0x19e   : > { %v1103_v41 = vpop.permute.xlu0 %1102  ;;  %v1101_v22 = vpop.permute.xlu1 %1100 }
 0x19f   : > { %v1108_v34 = vsel %vm907_vm7, %v1101_v22, %v1103_v41 }
 0x1a0   : > { %v1112_v24 = vadd.f32 %v1108_v34, %v1067_v27 }
 0x1a2   : > { %v1107_v58 = vpop.permute.xlu0 %1106  ;;  %v1105_v37 = vpop.permute.xlu1 %1104  ;;  %v1132_v14 = vadd.f32 %v1127_v43, %v1112_v24  ;;  %v1321_v24 = vmul.f32 %v3700_v39, %v2305_v21 }
 0x1a3   : > { %v1109_v60 = vsel %vm907_vm7, %v1105_v37, %v1107_v58 }
 0x1a4   : > { %v1113_v42 = vadd.f32 %v1109_v60, %v1068_v48 }
 0x1a6   : > { %v1168_v59 = vpop.permute.xlu0 %1167  ;;  %v1166_v61 = vpop.permute.xlu1 %1165  ;;  %v1133_v49 = vadd.f32 %v1129_v32, %v1113_v42 }
 0x1a7   : > { %v1173_v19 = vsel %vm394_vm3, %v1166_v61, %v1168_v59 }
 0x1a8   : > { %v1177_v44 = vadd.f32 %v1173_v19, %v1132_v14  ;;  %v1856_v14 = vld [vmem:[#allocation2 + $0x70] sm:$0xff] }
 0x1aa   : > { %v1172_v57 = vpop.permute.xlu0 %1171  ;;  %v1170_v9 = vpop.permute.xlu1 %1169 }
 0x1ab   : > { %v1174_v38 = vsel %vm394_vm3, %v1170_v9, %v1172_v57  ;;  %v1329_v9 = vrot.slane %v1321_v24, 3  ;;  %v1847_v24 = vld [vmem:[#allocation2 + $0x28] sm:$0xff] }
 0x1ac   : > { %v1178_v7 = vadd.f32 %v1174_v38, %v1133_v49  ;;  %v1328_v49 = vsel %vm1325_vm2, %v1326_v31, %v1327_v23  ;;  %v2310_v38 = vld [vmem:[%s4043_s2 + $0x14] ss:$0 sm:$0xff] }
 0x1ad   : > { %v1848_v31 = vld [vmem:[#allocation2 + $0x30] sm:$0xff] }
 0x1ae   : > { %v1213_v18 = vpop.permute.xlu0 %1212  ;;  %v1211_v5 = vpop.permute.xlu1 %1210 }
 0x1af   : > { %v1218_v0 = vsel %vm443_vm4, %v1211_v5, %v1213_v18 }
 0x1b0   : > { %v1222_v54 = vadd.f32 %v1218_v0, %v1177_v44  ;;  %v1855_v44 = vld [vmem:[#allocation2 + $0x68] sm:$0xff] }
 0x1b2   : > { %v1217_v17 = vpop.permute.xlu0 %1216  ;;  %v1215_v51 = vpop.permute.xlu1 %1214 }
 0x1b3   : > { %v1219_v58 = vsel %vm443_vm4, %v1215_v51, %v1217_v17 }
 0x1b4   : > { %v1223_v19 = vadd.f32 %v1219_v58, %v1178_v7  ;;  %v1854_v7 = vld [vmem:[#allocation2 + $0x60] sm:$0xff] }
 0x1b6   : > { %v1258_v6 = vpop.permute.xlu0 %1257  ;;  %v1256_v53 = vpop.permute.xlu1 %1255 }
 0x1b7   : > { %v1263_v63 = vsel %vm875_vm5, %v1256_v53, %v1258_v6  ;;  %v1520_v53 = vmul.f32 %v3714_v20, %v2310_v38 }
 0x1b8   : > { %v1267_v55 = vadd.f32 %v1263_v63, %v1222_v54 }
 0x1ba   : > { %v1262_v40 = vpop.permute.xlu0 %1261  ;;  %v1260_v25 = vpop.permute.xlu1 %1259 }
 0x1bb   : > { %v1264_v61 = vsel %vm875_vm5, %v1260_v25, %v1262_v40  ;;  %v1853_v40 = vld [vmem:[#allocation2 + $0x58] sm:$0xff]  ;;  %v1330_v25 = vsel %vm1325_vm2, %v1327_v23, %v1329_v9  ;;  %v1844_v9 = vld [vmem:[#allocation2 + $0x10] sm:$0xff] }
 0x1bc   : > { %v1268_v18 = vadd.f32 %v1264_v61, %v1223_v19  ;;  %v1845_v61 = vld [vmem:[#allocation2 + $0x18] sm:$0xff] }
 0x1be   : > { %v1303_v28 = vpop.permute.xlu0 %1302  ;;  %v1301_v15 = vpop.permute.xlu1 %1300 }
 0x1bf   : > { %v1308_v37 = vsel %vm907_vm7, %v1301_v15, %v1303_v28  ;;  %v1521_v15 = vmul.f32 %v3649_v52, %v2310_v38  ;;  %v1851_v52 = vld [vmem:[#allocation2 + $0x48] sm:$0xff] }
 0x1c0   : > { %v1312_v32 = vadd.f32 %v1308_v37, %v1267_v55 }
 0x1c1   : > { %v1528_v63 = vrot.slane %v1521_v15, 4 }
 0x1c2   : > { %v1307_v35 = vpop.permute.xlu0 %1306  ;;  %v1305_v26 = vpop.permute.xlu1 %1304  ;;  %v1333_v6 = vadd.f32 %v1328_v49, %v1312_v32 }
 0x1c3   : > { %v1309_v57 = vsel %vm907_vm7, %v1305_v26, %v1307_v35 }
 0x1c4   : > { %v1313_v51 = vadd.f32 %v1309_v57, %v1268_v18 }
 0x1c6   : > { %v1369_v33 = vpop.permute.xlu0 %1368  ;;  %v1367_v11 = vpop.permute.xlu1 %1366 }
 0x1ca   : > { %v3880_v2 = vpop.permute.xlu0 %1372  ;;  %v3882_v45 = vpop.permute.xlu1 %1370 }
 0x1ce   : > { %v1414_v16 = vpop.permute.xlu0 %1413  ;;  %v1412_v29 = vpop.permute.xlu1 %1411 }
 0x1cf   : > { %v1419_v28 = vsel %vm443_vm4, %v1412_v29, %v1414_v16  ;;  %v1527_v16 = vrot.slane %v1520_v53, 4  ;;  %v1842_v53 = vld [vmem:[#allocation2] sm:$0xff] }
 0x1d2   : > { %v3884_v47 = vpop.permute.xlu0 %1417  ;;  %v3886_v36 = vpop.permute.xlu1 %1415 }
 0x1d3   : > { %v1420_v29 = vsel %vm443_vm4, %v3886_v36, %v3884_v47 }
 0x1d6   : > { %v3888_v46 = vpop.permute.xlu0 %1458  ;;  %v3890_v62 = vpop.permute.xlu1 %1456 }
 0x1d7   : > { %v1464_v20 = vsel %vm875_vm5, %v3890_v62, %v3888_v46 }
 0x1da   : > { %v3892_v50 = vpop.permute.xlu0 %1462  ;;  %v3894_v1 = vpop.permute.xlu1 %1460 }
 0x1de   : > { %v3896_v8 = vpop.permute.xlu0 %1503  ;;  %v3898_v3 = vpop.permute.xlu1 %1501 }
 0x1df   : > { %v1509_v0 = vsel %vm907_vm7, %v3898_v3, %v3896_v8  ;;  %v1529_v8 = vsel %vm1526_vm6, %v1527_v16, %v1528_v63 }
 0x1e2   : > { %v3903_v12 = vpop.permute.xlu0 %1507  ;;  %v3905_v27 = vpop.permute.xlu1 %1505 }
 0x1e6   : > { %v2531_v10 = vpop.permute.xlu0 %2530  ;;  %v2526_v56 = vpop.permute.xlu1 %2525 }
 0x1e7   : > { %v2533_v48 = vunpack.i.h.bf16 %v2531_v10  ;;  %v2532_v41 = vunpack.i.l.bf16 %v2531_v10  ;;  %v2528_v22 = vunpack.i.h.bf16 %v2526_v56  ;;  %v2527_v34 = vunpack.i.l.bf16 %v2526_v56  ;;  %v1850_v56 = vld [vmem:[#allocation2 + $0x40] sm:$0xff] }
 0x1e9   : > { %v1761_v60 = vsel %vm394_vm3, %v2527_v34, %v2528_v22  ;;  %v1762_v43 = vsel %vm394_vm3, %v2532_v41, %v2533_v48  ;;  %v1465_v48 = vsel %vm875_vm5, %v3894_v1, %v3892_v50  ;;  %v1849_v41 = vld [vmem:[#allocation2 + $0x38] sm:$0xff] }
 0x1ea   : > { %v3916_v42 = vpop.permute.xlu0 %1569  ;;  %v3918_v59 = vpop.permute.xlu1 %1567  ;;  %2401 = vmatprep.mubr.f32.mxu0 %v1761_v60 }
 0x1eb   : > { %2402 = vmatmul.mubr.f32.vlgmr.msra.gmra.mxu0 %v1762_v43  ;;  %v1575_v50 = vsel %vm394_vm3, %v3918_v59, %v3916_v42  ;;  %v1846_v43 = vld [vmem:[#allocation2 + $0x20] sm:$0xff] }
 0x1ec   : > { %2405 = vmatpush3.msra.mxu0 %v3774_v13  ;;  %v1374_v13 = vsel %vm394_vm3, %v1367_v11, %v1369_v33  ;;  %v1375_v33 = vsel %vm394_vm3, %v3882_v45, %v3880_v2  ;;  %v1334_v11 = vadd.f32 %v1330_v25, %v1313_v51  ;;  %v1522_v2 = vmul.f32 %v3700_v39, %v2310_v38 }
 0x1ed   : > { %2406 = vmatprep.subr.mxu0 %v1856_v14  ;;  %v1378_v35 = vadd.f32 %v1374_v13, %v1333_v6  ;;  %v1510_v39 = vsel %vm907_vm7, %v3905_v27, %v3903_v12 }
 0x1ee   : > { %2407 = vmatpush3.msra.mxu0 %v1856_v14  ;;  %v3927_v5 = vpop.permute.xlu0 %1573  ;;  %v3929_v17 = vpop.permute.xlu1 %1571  ;;  %v1379_v45 = vadd.f32 %v1375_v33, %v1334_v11  ;;  %v1530_v3 = vrot.slane %v1522_v2, 4 }
 0x1ef   : > { %2408 = vmatprep.subr.mxu0 %v1855_v44  ;;  %v1423_v30 = vadd.f32 %v1419_v28, %v1378_v35  ;;  %v1576_v55 = vsel %vm394_vm3, %v3929_v17, %v3927_v5  ;;  %v1942_v28 = vld [vmem:[%s4047_s6] sm:$0xff] }
 0x1f0   : > { %2409 = vmatpush3.msra.mxu0 %v1855_v44  ;;  %v1424_v47 = vadd.f32 %v1420_v29, %v1379_v45  ;;  %v1531_v12 = vsel %vm1526_vm6, %v1528_v63, %v1530_v3  ;;  %2443 = vmatprep.mubr.msk.f32.mxu1 %vm1946_vm8, %v1942_v28  ;;  %v2315_v35 = vld [vmem:[%s4046_s5] ss:$0 sm:$0xff] }
 0x1f1   : > { %2410 = vmatprep.subr.mxu0 %v1854_v7  ;;  %v1468_v46 = vadd.f32 %v1464_v20, %v1423_v30  ;;  %v2068_v3 = vld [vmem:[#allocation5 + $0xc0] sm:$0xff] }
 0x1f2   : > { %2411 = vmatpush3.msra.mxu0 %v1854_v7  ;;  %v1615_v26 = vpop.permute.xlu0 %1614  ;;  %v1613_v21 = vpop.permute.xlu1 %1612  ;;  %v1469_v22 = vadd.f32 %v1465_v48, %v1424_v47  ;;  %v1843_v7 = vld [vmem:[#allocation2 + $0x8] sm:$0xff]  ;;  %v2072_v47 = vld [vmem:[#allocation5 + $0xe0] sm:$0xff] }
 0x1f3   : > { %2412 = vmatprep.subr.mxu0 %v1853_v40  ;;  %v1513_v36 = vadd.f32 %v1509_v0, %v1468_v46  ;;  %v1620_v27 = vsel %vm443_vm4, %v1613_v21, %v1615_v26  ;;  %v2316_v21 = vld [vmem:[%s4046_s5 + $0x1] ss:$0 sm:$0xff]  ;;  %v1943_v46 = vld [vmem:[%s4047_s6 + $0x8] sm:$0xff] }
 0x1f4   : > { %2413 = vmatpush3.msra.mxu0 %v1853_v40  ;;  %v1514_v1 = vadd.f32 %v1510_v39, %v1469_v22  ;;  %v2073_v48 = vld [vmem:[#allocation5 + $0xe8] sm:$0xff]  ;;  %v2070_v39 = vld [vmem:[#allocation5 + $0xd0] sm:$0xff]  ;;  %v2067_v22 = vld [vmem:[#allocation5 + $0xb8] sm:$0xff] }
 0x1f5   : > { %2414 = vmatprep.subr.mxu0 %v1852_v4  ;;  %v1534_v23 = vadd.f32 %v1529_v8, %v1513_v36  ;;  %v1945_v36 = vld [vmem:[%s4047_s6 + $0x18] sm:$0xff]  ;;  %v2069_v8 = vld [vmem:[#allocation5 + $0xc8] sm:$0xff] }
 0x1f6   : > { %2415 = vmatpush3.msra.mxu0 %v1852_v4  ;;  %v1619_v62 = vpop.permute.xlu0 %1618  ;;  %v1617_v10 = vpop.permute.xlu1 %1616  ;;  %v1535_v59 = vadd.f32 %v1531_v12, %v1514_v1  ;;  %v2062_v1 = vld [vmem:[#allocation5 + $0x90] sm:$0xff]  ;;  %v2059_v12 = vld [vmem:[#allocation5 + $0x78] sm:$0xff] }
 0x1f7   : > { %2416 = vmatprep.subr.mxu0 %v1851_v52  ;;  %v1579_v58 = vadd.f32 %v1575_v50, %v1534_v23  ;;  %v1621_v19 = vsel %vm443_vm4, %v1617_v10, %v1619_v62  ;;  %v2075_v62 = vld [vmem:[#allocation5 + $0xf8] sm:$0xff]  ;;  %v1944_v10 = vld [vmem:[%s4047_s6 + $0x10] sm:$0xff]  ;;  %v2061_v23 = vld [vmem:[#allocation5 + $0x88] sm:$0xff] }
 0x1f8   : > { %2417 = vmatpush3.msra.mxu0 %v1851_v52  ;;  %v1580_v32 = vadd.f32 %v1576_v55, %v1535_v59  ;;  %v2063_v50 = vld [vmem:[#allocation5 + $0x98] sm:$0xff]  ;;  %v2053_v55 = vld [vmem:[#allocation5 + $0x48] sm:$0xff] }
 0x1f9   : > { %2418 = vmatprep.subr.mxu0 %v1850_v56  ;;  %v1624_v14 = vadd.f32 %v1620_v27, %v1579_v58  ;;  %v2058_v27 = vld [vmem:[#allocation5 + $0x70] sm:$0xff]  ;;  %v2057_v58 = vld [vmem:[#allocation5 + $0x68] sm:$0xff]  ;;  %v2051_v59 = vld [vmem:[#allocation5 + $0x38] sm:$0xff] }
 0x1fa   : > { %2419 = vmatpush3.msra.mxu0 %v1850_v56  ;;  %v1660_v34 = vpop.permute.xlu0 %1659  ;;  %v1658_v54 = vpop.permute.xlu1 %1657  ;;  %v1625_v5 = vadd.f32 %v1621_v19, %v1580_v32  ;;  %v2074_v56 = vld [vmem:[#allocation5 + $0xf0] sm:$0xff]  ;;  %v2048_v19 = vld [vmem:[#allocation5 + $0x20] sm:$0xff]  ;;  %v2047_v32 = vld [vmem:[#allocation5 + $0x18] sm:$0xff] }
 0x1fb   : > { %2420 = vmatprep.subr.mxu0 %v1849_v41  ;;  %v1665_v42 = vsel %vm875_vm5, %v1658_v54, %v1660_v34  ;;  %v2066_v34 = vld [vmem:[#allocation5 + $0xb0] sm:$0xff]  ;;  %v2065_v54 = vld [vmem:[#allocation5 + $0xa8] sm:$0xff] }
 0x1fc   : > { %2421 = vmatpush3.msra.mxu0 %v1849_v41  ;;  %v1669_v44 = vadd.f32 %v1665_v42, %v1624_v14  ;;  %v2071_v41 = vld [vmem:[#allocation5 + $0xd8] sm:$0xff]  ;;  %v2052_v42 = vld [vmem:[#allocation5 + $0x40] sm:$0xff]  ;;  %v2050_v14 = vld [vmem:[#allocation5 + $0x30] sm:$0xff] }
 0x1fd   : > { %2422 = vmatprep.subr.mxu0 %v1848_v31 }
 0x1fe   : > { %2423 = vmatpush3.msra.mxu0 %v1848_v31  ;;  %v1664_v37 = vpop.permute.xlu0 %1663  ;;  %v1662_v60 = vpop.permute.xlu1 %1661  ;;  %v2064_v31 = vld [vmem:[#allocation5 + $0xa0] sm:$0xff] }
 0x1ff   : > { %2424 = vmatprep.subr.mxu0 %v1847_v24  ;;  %v1666_v38 = vsel %vm875_vm5, %v1662_v60, %v1664_v37  ;;  %v2056_v37 = vld [vmem:[#allocation5 + $0x60] sm:$0xff]  ;;  %v2055_v60 = vld [vmem:[#allocation5 + $0x58] sm:$0xff] }
 0x200   : > { %2425 = vmatpush3.msra.mxu0 %v1847_v24  ;;  %v1670_v13 = vadd.f32 %v1666_v38, %v1625_v5  ;;  %v2060_v24 = vld [vmem:[#allocation5 + $0x80] sm:$0xff] }
 0x201   : > { %2426 = vmatprep.subr.mxu0 %v1846_v43 }
 0x202   : > { %2427 = vmatpush3.msra.mxu0 %v1846_v43  ;;  %v1705_v57 = vpop.permute.xlu0 %1704  ;;  %v1703_v49 = vpop.permute.xlu1 %1702  ;;  %v2054_v43 = vld [vmem:[#allocation5 + $0x50] sm:$0xff] }
 0x203   : > { %v1710_v18 = vsel %vm907_vm7, %v1703_v49, %v1705_v57  ;;  %2428 = vmatprep.subr.mxu0 %v1845_v61  ;;  %v2045_v57 = vld [vmem:[#allocation5 + $0x8] sm:$0xff]  ;;  %v2044_v49 = vld [vmem:[#allocation5] sm:$0xff] }
 0x204   : > { %v1714_v17 = vadd.f32 %v1710_v18, %v1669_v44  ;;  %2429 = vmatpush3.msra.mxu0 %v1845_v61  ;;  %v2049_v61 = vld [vmem:[#allocation5 + $0x28] sm:$0xff]  ;;  %v2046_v44 = vld [vmem:[#allocation5 + $0x10] sm:$0xff] }
 0x205   : > { %2430 = vmatprep.subr.mxu0 %v1844_v9 }
 0x206   : > { %2431 = vmatpush3.msra.mxu0 %v1844_v9  ;;  %v1709_v51 = vpop.permute.xlu0 %1708  ;;  %v1707_v6 = vpop.permute.xlu1 %1706  ;;  %2436 = vmatprep.mubr.f32.mxu0 %v1714_v17  ;;  %v2676_v9 = vmov 0.0  }
 0x207   : > { %v1711_v40 = vsel %vm907_vm7, %v1707_v6, %v1709_v51  ;;  %2432 = vmatprep.subr.mxu0 %v1843_v7 }
 0x208   : > { %v1715_v25 = vadd.f32 %v1711_v40, %v1670_v13  ;;  %2433 = vmatpush3.msra.mxu0 %v1843_v7 }
 0x209   : > { %2434 = vmatprep.subr.mxu0 %v1842_v53 }
 0x20a   : > { %2435 = vmatpush3.msra.mxu0 %v1842_v53 }
 0x20b   : > { %2437 = vmatmul.mubr.f32.vlgmr.msra.gmra.mxu0 %v1715_v25 }
 0x2ab   : > { %v2403_v15 = vpop.f32.mrf.mxu0 }
 0x2ac   : > { %v1837_v4 = vadd.f32 %v2403_v15, %v2315_v35 }
 0x2ad   : > { %v1831_v26 = vpop.f32.mrf.mxu0 }
 0x2ae   : > { %v1832_v20 = vadd.f32 %v2315_v35, %v1831_v26  ;;  %v1841_v16 = vmax.f32 %v1837_v4, 0.0 }
 0x2b0   : > { %v1840_v0 = vmax.f32 %v1832_v20, 0.0 }
 0x2cb   : > { %v2438_v33 = vpop.f32.mrf.mxu0 }
 0x2cc   : > { %v1935_v11 = vadd.f32 %v2438_v33, %v2316_v21 }
 0x2cd   : > { %v1929_v30 = vpop.f32.mrf.mxu0 }
 0x2ce   : > { %v1939_v52 = vmax.f32 %v1935_v11, 0.0  ;;  %v1930_v29 = vadd.f32 %v2316_v21, %v1929_v30 }
 0x2d0   : > { %v1938_v63 = vmax.f32 %v1930_v29, 0.0  ;;  %v1941_v2 = vadd.f32 %v1939_v52, %v1841_v16 }
 0x2d2   : > { %v1940_v45 = vadd.f32 %v1938_v63, %v1840_v0  ;;  %2439 = vmatprep.subr.mxu1 %v1941_v2 }
 0x2d3   : > { %2440 = vmatpush3.msra.mxu1 %v1941_v2 }
 0x2d4   : > { %2441 = vmatprep.subr.mxu1 %v1940_v45 }
 0x2d5   : > { %2442 = vmatpush3.msra.mxu1 %v1940_v45 }
 0x2d6   : > { %2444 = vmatmul.mubr.msk.f32.vlgmr.msra.gmra.mxu1 %vm1946_vm8, %v1943_v46  ;;  %2076 = vmatprep.subr.mxu1 %v2075_v62 }
 0x2d7   : > { %2446 = vmatprep.mubr.msk.f32.mxu1 %vm1946_vm8, %v1944_v10  ;;  %2077 = vmatpush1.msra.mxu1 %v2074_v56 }
 0x2d8   : > { %2078 = vmatprep.subr.mxu1 %v2073_v48 }
 0x2d9   : > { %2079 = vmatpush1.msra.mxu1 %v2072_v47 }
 0x2da   : > { %2447 = vmatmul.mubr.msk.f32.gmra.mxu1 %vm1946_vm8, %v1945_v36  ;;  %2080 = vmatprep.subr.mxu1 %v2071_v41 }
 0x2db   : > { %2081 = vmatpush1.msra.mxu1 %v2070_v39  ;;  %2140 = vmatprep.mubr.f32.mxu1 %v2676_v9 }
 0x2dc   : > { %2082 = vmatprep.subr.mxu1 %v2069_v8 }
 0x2dd   : > { %2083 = vmatpush1.msra.mxu1 %v2068_v3 }
 0x2de   : > { %2084 = vmatprep.subr.mxu1 %v2067_v22 }
 0x2df   : > { %2085 = vmatpush1.msra.mxu1 %v2066_v34 }
 0x2e0   : > { %2086 = vmatprep.subr.mxu1 %v2065_v54 }
 0x2e1   : > { %2087 = vmatpush1.msra.mxu1 %v2064_v31 }
 0x2e2   : > { %2088 = vmatprep.subr.mxu1 %v2063_v50 }
 0x2e3   : > { %2089 = vmatpush1.msra.mxu1 %v2062_v1 }
 0x2e4   : > { %2090 = vmatprep.subr.mxu1 %v2061_v23 }
 0x2e5   : > { %2091 = vmatpush1.msra.mxu1 %v2060_v24 }
 0x2e6   : > { %2092 = vmatprep.subr.mxu1 %v2059_v12 }
 0x2e7   : > { %2093 = vmatpush1.msra.mxu1 %v2058_v27 }
 0x2e8   : > { %2094 = vmatprep.subr.mxu1 %v2057_v58 }
 0x2e9   : > { %2095 = vmatpush1.msra.mxu1 %v2056_v37 }
 0x2ea   : > { %2096 = vmatprep.subr.mxu1 %v2055_v60 }
 0x2eb   : > { %2097 = vmatpush1.msra.mxu1 %v2054_v43 }
 0x2ec   : > { %2098 = vmatprep.subr.mxu1 %v2053_v55 }
 0x2ed   : > { %2099 = vmatpush1.msra.mxu1 %v2052_v42 }
 0x2ee   : > { %2100 = vmatprep.subr.mxu1 %v2051_v59 }
 0x2ef   : > { %2101 = vmatpush1.msra.mxu1 %v2050_v14 }
 0x2f0   : > { %2102 = vmatprep.subr.mxu1 %v2049_v61 }
 0x2f1   : > { %2103 = vmatpush1.msra.mxu1 %v2048_v19 }
 0x2f2   : > { %2104 = vmatprep.subr.mxu1 %v2047_v32 }
 0x2f3   : > { %2105 = vmatpush1.msra.mxu1 %v2046_v44 }
 0x2f4   : > { %2106 = vmatprep.subr.mxu1 %v2045_v57 }
 0x2f5   : > { %2107 = vmatpush1.msra.mxu1 %v2044_v49 }
 0x396   : > { %v2445_v38 = vpop.f32.mrf.mxu1 }
 0x398   : > { %v2025_v18 = vpop.f32.mrf.mxu1 }
 0x399   : > { %2141 = vmatmul.mubr.f32.vlgmr.msra.gmra.mxu1 %v2025_v18 }
 0x39a   : > { %2146 = vmatprep.mubr.f32.mxu1 %v2676_v9  ;;  %v2448_v5 = vpop.f32.mrf.mxu1 }
 0x39c   : > { %v2035_v17 = vpop.f32.mrf.mxu1 }
 0x39d   : > { %2147 = vmatmul.mubr.f32.gmra.mxu1 %v2445_v38 }
 0x39e   : > { %2152 = vmatprep.mubr.f32.mxu1 %v2676_v9 }
 0x3a1   : > { %2153 = vmatmul.mubr.f32.gmra.mxu1 %v2035_v17 }
 0x3a2   : > { %2158 = vmatprep.mubr.f32.mxu1 %v2676_v9 }
 0x3a5   : > { %2159 = vmatmul.mubr.f32.gmra.mxu1 %v2448_v5 }
 0x459   : > { %v2142_v7 = vpop.f32.mrf.mxu1 }
 0x45a   : > { %2165 = vst [vmem:[%s328_s25] sm:$0xff] %v2142_v7 }
 0x45b   : > { %v2144_v13 = vpop.f32.mrf.mxu1 }
 0x45c   : > { %2166 = vst [vmem:[%s328_s25 + $0x8] sm:$0xff] %v2144_v13 }
 0x45d   : > { %v2148_v51 = vpop.f32.mrf.mxu1 }
 0x45e   : > { %2167 = vst [vmem:[%s328_s25 + $0x10] sm:$0xff] %v2148_v51 }
 0x45f   : > { %v2150_v6 = vpop.f32.mrf.mxu1 }
 0x460   : > { %2168 = vst [vmem:[%s328_s25 + $0x18] sm:$0xff] %v2150_v6 }
 0x461   : > { %v2154_v53 = vpop.f32.mrf.mxu1 }
 0x462   : > { %2169 = vst [vmem:[%s328_s25 + $0x20] sm:$0xff] %v2154_v53 }
 0x463   : > { %v2156_v40 = vpop.f32.mrf.mxu1 }
 0x464   : > { %2170 = vst [vmem:[%s328_s25 + $0x28] sm:$0xff] %v2156_v40 }
 0x465   : > { %v2160_v25 = vpop.f32.mrf.mxu1 }
 0x466   : > { %2171 = vst [vmem:[%s328_s25 + $0x30] sm:$0xff] %v2160_v25 }
 0x467   : > { %v2162_v28 = vpop.f32.mrf.mxu1 }
 0x468   : > { %2172 = vst [vmem:[%s328_s25 + $0x38] sm:$0xff] %v2162_v28 }
 0x469   : > { %2605 = shalt.err (!%p2602_p3)
}
 0x46a   : > { %s2606_s19 = scalar_lea.hbm %s3998_s18, 1024  ;;  %s2610_s17 = scalar_lea.hbm %s4049_s8, 2048 }
 0x46b   : > { %p2607_p2 = scmp.ne.s32.totalorder %s3998_s18, %s2606_s19  ;;  %p2611_p6 = scmp.lt.s32.totalorder %s3998_s18, %s4049_s8 }
 0x46c   : > { %p2612_p9 = scmp.lt.s32.totalorder %s2610_s17, %s2606_s19 }
 0x46d   : > { %p2608_p4 = pnand %p2607_p2, %p2762_p5 }
 0x46e   : > { %p2613_p10 = por %p2612_p9, %p2611_p6 }
 0x46f   : > { %p2609_p13 = pneg %p2608_p4 }
 0x471   : > { %p2614_p12 = pnand %p2613_p10, %p2609_p13 }
 0x473   : > { %2617 = shalt.err (!%p2614_p12)
}
 0x474   : > { %s2678_s12 = smov 256  }
 0x475   : > { %2458 = dma.vmem_to_hbm [thread:$0]  (%p2762_p5), %s3993_s20, 1024, %s3998_s18, %s4000_s10, %s2678_s12, %s2678_s12, %s2668_s22  }
 0x476 PF: > { %p2475_p7 = scmp.ge.s32.totalorder %s2660_s30, 2  ;;  %s2202_s9 = sand.u32 1, %s2648_s27  }
 0x477   : > { %p4110_p8 = scmp.ne.s32.totalorder %s4061_s16, 0  ;;  %s2203_s21 = scalar_lea.sflag [#allocation4], %s2202_s9 }
 0x479   : > { %p2468_p11 = pnand %p2475_p7, %p4110_p8 }
 0x47b   : > { %p2469_p0 = pneg %p2468_p11 }
 0x47d   : > { %2643 = dma.done.wait (%p2469_p0), %s2203_s21, 1024  }
 0x47e   : > { %2645 = vsyncadd (%p2469_p0), %s2203_s21, 4294966272  ;;  %p20_p1 = scmp.ge.s32.totalorder %s2749_s11, 4   ;;  %s4111_s27 = smov %s2652_s28 }
 0x47f   : > { %s4112_s28 = smov %s2656_s29  ;;  %s4113_s29 = smov %s2760_s14 }
 0x480   : > { %s4114_s30 = smov %s2749_s11  ;;  %22 = sbr.rel (!%p20_p1) target bundleno = 5 (0x5), region = 96 }
 0x485   :  { %2208 = vsyncpa [#allocation3], 1 }
 0x486   :  { %2210 = vsyncpa [#allocation3 + $0x1], 1 }
 0x487   :  { %2211 = vsyncpa [#allocation6], 1 }
 0x488   :  { %2212 = vsyncpa [#allocation4], 1 }
 0x489   :  { %2214 = vsyncpa [#allocation4 + $0x1], 1 }

</bundles_post_ra>
